<compile_context>
chip_gen: v7x
topology: tpu7x:2x2x1
jax: 0.10.0
libtpu: 0.0.40
codegen_flags: <defaults>
</compile_context>

<pallas_src>
import functools

import jax
import jax.numpy as jnp
from jax.experimental import pallas as pl
from jax.experimental.pallas import tpu as pltpu

_SLAB_W = 128  # lane width of the packed weight slab / padded head output


def _fused_tcn_kernel(x_ref, slab_ref, o_ref, feat_scratch, *, meta, seq_len):
    """Whole network for one batch tile of TILE_N sequences.

    x_ref:        (TILE_N*L, C_in)   activations (time-major within each sequence)
    slab_ref:     (R, 128)           all weights/biases packed row-wise
    o_ref:        (TILE_N, 128)      padded head output (lane-dense store)
    feat_scratch: (TILE_N*L, C_last) VMEM scratch for the strided last-step read
    """
    rows = x_ref.shape[0]
    n_tile = rows // seq_len
    kernel_size = meta["kernel_size"]
    # per-sequence time index; tiles always hold whole sequences
    row_mod = jax.lax.broadcasted_iota(jnp.int32, (rows, 1), 0) % seq_len

    h = x_ref[...]                                            # (rows, C_in)
    for bm in meta["blocks"]:
        d = bm["dilation"]
        cin, cout, cout_ext = bm["cin"], bm["cout"], bm["cout_ext"]

        # Hoisted causal masks, shared by conv_a and conv_b (same shift set).
        masks = {}
        for k in range(kernel_size - 1):
            s = (kernel_size - 1 - k) * d
            if s not in masks:
                masks[s] = row_mod < s

        def conv(hin, c_in_w, tap_offs, b_off, width):
            """Causal dilated conv1d as a sum of K per-tap dots.

            dot(roll(h, s), w_k) == roll(dot(h, w_k), s) along the row axis, so
            the rolls/masks act on the (rows, width) products and no sub-128-lane
            concat is needed.  Rows with (t % L) < shift have no valid past
            sample (and would otherwise wrap across sequence boundaries) -> 0.
            Equivalent to Conv1d(padding=(K-1)*d, dilation=d) + Chomp1d.
            """
            taps = [slab_ref[o:o + c_in_w, 0:width] for o in tap_offs]
            bias = slab_ref[b_off:b_off + 1, 0:width]
            acc = jnp.dot(hin, taps[kernel_size - 1],
                          preferred_element_type=jnp.float32)    # shift == 0 tap
            for k in range(kernel_size - 1):
                s = (kernel_size - 1 - k) * d
                p = jnp.dot(hin, taps[k], preferred_element_type=jnp.float32)
                p = pltpu.roll(p, shift=s, axis=0)
                p = jnp.where(masks[s], jnp.float32(0.0), p)
                acc = acc + p
            return acc + bias

        # conv_a with the 1x1 downsample fused into lanes [cout:cout_ext].
        out_a_ext = conv(h, cin, bm["tap_a"], bm["b_a"], cout_ext)
        out_a = jnp.maximum(out_a_ext[:, :cout], 0.0)
        res = out_a_ext[:, cout:cout_ext] if bm["has_ds"] else h
        # TODO(synk): nn.Dropout is identity in eval mode; not applied here.
        out_b = conv(out_a, cout, bm["tap_b"], bm["b_b"], cout)
        out_b = jnp.maximum(out_b, 0.0)
        h = jnp.maximum(out_b + res, 0.0)                        # (rows, cout)

    # y1[:, :, -1]: strided sublane read of the last time step of each sequence.
    feat_scratch[...] = h
    feat = feat_scratch[pl.ds(seq_len - 1, n_tile, stride=seq_len), :]

    w_off, b_off = meta["head"]
    c_last = meta["c_last"]
    w_head = slab_ref[w_off:w_off + c_last, :]                   # folded lw1 @ lw2
    b_head = slab_ref[b_off:b_off + 1, :]
    # single lane-dense (TILE_N, 128) store
    o_ref[...] = jnp.dot(feat, w_head, preferred_element_type=jnp.float32) + b_head


def prepare_tcn_params(params, *, kernel_size):
    """One-time packing: every weight/bias -> one (R, 128) slab + static offsets.

    Each entry is padded to 128 lanes and an 8-row-aligned row count, so every
    in-kernel static slice starts on a sublane-tile boundary.  The two head
    Linears are folded into one matmul (no activation between them in the
    PyTorch module), and each block's 1x1 downsample is appended as extra output
    columns of the shift==0 tap of conv_a.
    """
    entries = []
    offset = 0

    def add(a):
        nonlocal offset
        r, c = a.shape
        assert c <= _SLAB_W
        rp = ((r + 7) // 8) * 8
        padded = jnp.zeros((rp, _SLAB_W), jnp.float32).at[:r, :c].set(
            a.astype(jnp.float32))
        entries.append(padded)
        off = offset
        offset += rp
        return off

    blocks_meta = []
    for blk in params["blocks"]:
        k, cin, cout = blk["w1"].shape
        assert k == kernel_size
        has_ds = blk["has_ds"]
        cout_ext = cout + (cout if has_ds else 0)
        assert cout_ext <= _SLAB_W

        tap_a = []
        for t in range(k):
            w = jnp.zeros((cin, cout_ext), jnp.float32).at[:, :cout].set(blk["w1"][t])
            if has_ds and t == k - 1:      # shift==0 tap also carries the 1x1 downsample
                w = w.at[:, cout:cout_ext].set(blk["wd"])
            tap_a.append(add(w))
        b_a = jnp.zeros((1, cout_ext), jnp.float32).at[:, :cout].set(blk["b1"])
        if has_ds:
            b_a = b_a.at[:, cout:cout_ext].set(blk["bd"])
        b_a_off = add(b_a)

        tap_b = tuple(add(blk["w2"][t]) for t in range(k))
        b_b_off = add(blk["b2"])

        blocks_meta.append(dict(dilation=blk["dilation"], has_ds=has_ds,
                                cin=cin, cout=cout, cout_ext=cout_ext,
                                tap_a=tuple(tap_a), b_a=b_a_off,
                                tap_b=tap_b, b_b=b_b_off))

    # Fold the head: linear2(linear1(x)) == x @ (lw1 @ lw2) + (lb1 @ lw2 + lb2).
    c_last = params["lw1"].shape[0]
    out_dim = params["lw2"].shape[1]
    assert out_dim <= _SLAB_W
    w_head = params["lw1"] @ params["lw2"]
    b_head = params["lb1"] @ params["lw2"] + params["lb2"]
    head = (add(w_head), add(b_head))

    slab = jnp.concatenate(entries, axis=0)
    meta = dict(blocks=tuple(blocks_meta), head=head, kernel_size=kernel_size,
                c_last=int(c_last), out_dim=int(out_dim))
    return slab, meta


def tcn_huake_forward(x_ncl, slab, meta, *, tile_n=8):
    """x_ncl: (N, C_in, L_in), same convention as the PyTorch module.

    tile_n: sequences per grid step (multiple of 8).  Size it so
    tile_n * L * max_channels * 4B (plus double-buffering) fits comfortably in
    scoped VMEM — roughly half on v7x (64 MiB physical) vs v5e/v6e (128 MiB).
    """
    assert tile_n % 8 == 0
    n, c_in, seq_len = x_ncl.shape
    out_dim = meta["out_dim"]

    # (N, C, L) -> (N, L, C), pad batch to a multiple of tile_n, flatten to (N*L, C).
    x = jnp.transpose(x_ncl, (0, 2, 1)).astype(jnp.float32)
    n_pad = ((n + tile_n - 1) // tile_n) * tile_n
    if n_pad != n:
        x = jnp.pad(x, ((0, n_pad - n), (0, 0), (0, 0)))
    x = x.reshape(n_pad * seq_len, c_in)

    rows_tile = tile_n * seq_len
    grid = (n_pad // tile_n,)

    out = pl.pallas_call(
        functools.partial(_fused_tcn_kernel, meta=meta, seq_len=seq_len),
        out_shape=jax.ShapeDtypeStruct((n_pad, _SLAB_W), jnp.float32),
        grid_spec=pltpu.PrefetchScalarGridSpec(
            num_scalar_prefetch=0,
            grid=grid,
            in_specs=[
                pl.BlockSpec((rows_tile, c_in), lambda i: (i, 0)),   # batch tile
                pl.BlockSpec(slab.shape, lambda i: (0, 0)),          # resident weights
            ],
            out_specs=pl.BlockSpec((tile_n, _SLAB_W), lambda i: (i, 0)),
            scratch_shapes=[pltpu.VMEM((rows_tile, meta["c_last"]), jnp.float32)],
        ),
        compiler_params=pltpu.CompilerParams(
            dimension_semantics=("parallel",)),      # megacore-shard the batch grid
    )(x, slab)
    return out[:n, :out_dim]


def init_params(key, input_size, output_size, num_channels, kernel_size):
    params = {"blocks": []}
    in_c = input_size
    for i, out_c in enumerate(num_channels):
        key, k1, k2, k3, k4, k5, k6 = jax.random.split(key, 7)
        has_ds = in_c != out_c
        blk = {
            "w1": jax.random.normal(k1, (kernel_size, in_c, out_c), jnp.float32) * 0.1,
            "b1": jax.random.normal(k2, (1, out_c), jnp.float32) * 0.1,
            "w2": jax.random.normal(k3, (kernel_size, out_c, out_c), jnp.float32) * 0.1,
            "b2": jax.random.normal(k4, (1, out_c), jnp.float32) * 0.1,
            "has_ds": has_ds,
            "dilation": 2 ** i,
        }
        if has_ds:
            blk["wd"] = jax.random.normal(k5, (in_c, out_c), jnp.float32) * 0.1
            blk["bd"] = jax.random.normal(k6, (1, out_c), jnp.float32) * 0.1
        params["blocks"].append(blk)
        in_c = out_c
    key, kl1, kb1, kl2, kb2 = jax.random.split(key, 5)
    params["lw1"] = jax.random.normal(kl1, (num_channels[-1], 16), jnp.float32) * 0.1
    params["lb1"] = jax.random.normal(kb1, (1, 16), jnp.float32) * 0.1
    params["lw2"] = jax.random.normal(kl2, (16, output_size), jnp.float32) * 0.1
    params["lb2"] = jax.random.normal(kb2, (1, output_size), jnp.float32) * 0.1
    return params


def _ref_forward(x_ncl, params, *, kernel_size):
    """Pure-JAX reference (matches the PyTorch module at inference)."""
    x = jnp.transpose(x_ncl, (0, 2, 1)).astype(jnp.float32)  # (N, L, C)

    def conv(h, w, b, d):
        n_, l_, _ = h.shape
        out = jnp.zeros((n_, l_, w.shape[2]), jnp.float32)
        for k in range(kernel_size):
            shift = (kernel_size - 1 - k) * d
            contrib = jnp.einsum("nlc,cd->nld", h, w[k])
            if shift > 0:
                contrib = jnp.pad(contrib, ((0, 0), (shift, 0), (0, 0)))[:, :l_, :]
            out = out + contrib
        return out + b[None]

    for blk in params["blocks"]:
        h = jax.nn.relu(conv(x, blk["w1"], blk["b1"], blk["dilation"]))
        h = jax.nn.relu(conv(h, blk["w2"], blk["b2"], blk["dilation"]))
        if blk["has_ds"]:
            res = jnp.einsum("nlc,cd->nld", x, blk["wd"]) + blk["bd"][None]
        else:
            res = x
        x = jax.nn.relu(h + res)
    feat = x[:, -1, :]
    h1 = feat @ params["lw1"] + params["lb1"]
    return h1 @ params["lw2"] + params["lb2"]


if __name__ == "__main__":
    # TCN_huake(input_size=4, output_size=3, num_channels=[8, 8], kernel_size=3, dropout=0.2)
    N, C_IN, L = 2, 4, 16
    NUM_CHANNELS = [8, 8]
    KERNEL_SIZE = 3
    OUTPUT_SIZE = 3

    key = jax.random.PRNGKey(0)
    kx, kp = jax.random.split(key)
    x = jax.random.normal(kx, (N, C_IN, L), jnp.float32)       # (N, C_in, L_in)
    params = init_params(kp, C_IN, OUTPUT_SIZE, NUM_CHANNELS, KERNEL_SIZE)

    slab, meta = prepare_tcn_params(params, kernel_size=KERNEL_SIZE)   # one-time prep
    out = tcn_huake_forward(x, slab, meta, tile_n=8)
    jax.block_until_ready(out)
    assert out.shape == (N, OUTPUT_SIZE)

    ref = _ref_forward(x, params, kernel_size=KERNEL_SIZE)
    assert jnp.allclose(out, ref, rtol=1e-3, atol=1e-3), (out, ref)
    print("KERNEL_OK")
</pallas_src>

<mosaic_0001>
module attributes {stable_mosaic.version = 11 : i64} {
  func.func @_fused_tcn_kernel(%arg0: i32, %arg1: memref<128x4xf32, #tpu.memory_space<vmem>>, %arg2: memref<144x128xf32, #tpu.memory_space<vmem>>, %arg3: memref<8x128xf32, #tpu.memory_space<vmem>>, %arg4: memref<128x8xf32, #tpu.memory_space<vmem>>) attributes {dimension_semantics = [#tpu.dimension_semantics<parallel>], iteration_bounds = array<i64: 1>, scalar_prefetch = 0 : i64, scratch_operands = 1 : i64, tpu.core_type = #tpu.core_type<tc>, window_params = [{transform_indices = @transform_0, window_bounds = array<i64: 128, 4>}, {pipeline_mode = #tpu.pipeline_mode<synchronous>, transform_indices = @transform_1, window_bounds = array<i64: 144, 128>}, {transform_indices = @transform_2, window_bounds = array<i64: 8, 128>}]} {
    %0 = tpu.iota {dimensions = array<i32: 0>} : vector<128x1xi32>
    %c16_i32 = arith.constant 16 : i32
    %c0_i32 = arith.constant 0 : i32
    %1 = arith.cmpi eq, %c16_i32, %c0_i32 : i32
    %c1_i32 = arith.constant 1 : i32
    %2 = arith.select %1, %c1_i32, %c16_i32 : i32
    %3 = vector.broadcast %2 : i32 to vector<128x1xi32>
    %4 = arith.remsi %0, %3 : vector<128x1xi32>
    %c0_i32_0 = arith.constant 0 : i32
    %5 = vector.broadcast %c0_i32_0 : i32 to vector<128x1xi32>
    %6 = arith.cmpi ne, %4, %5 : vector<128x1xi32>
    %c0_i32_1 = arith.constant 0 : i32
    %7 = vector.broadcast %c0_i32_1 : i32 to vector<128x1xi32>
    %8 = arith.cmpi slt, %4, %7 : vector<128x1xi32>
    %c0_i32_2 = arith.constant 0 : i32
    %9 = arith.cmpi slt, %2, %c0_i32_2 : i32
    %10 = vector.broadcast %9 : i1 to vector<128x1xi1>
    %11 = vector.broadcast %10 : vector<128x1xi1> to vector<128x1xi1>
    %12 = arith.xori %8, %11 : vector<128x1xi1>
    %13 = arith.andi %12, %6 : vector<128x1xi1>
    %14 = vector.broadcast %2 : i32 to vector<128x1xi32>
    %15 = arith.addi %4, %14 : vector<128x1xi32>
    %16 = arith.select %13, %15, %4 : vector<128x1xi1>, vector<128x1xi32>
    %c0 = arith.constant 0 : index
    %c0_3 = arith.constant 0 : index
    %17 = vector.load %arg1[%c0, %c0_3] : memref<128x4xf32, #tpu.memory_space<vmem>>, vector<128x4xf32>
    %c2_i32 = arith.constant 2 : i32
    %18 = vector.broadcast %c2_i32 : i32 to vector<128x1xi32>
    %19 = arith.cmpi slt, %16, %18 : vector<128x1xi32>
    %c1_i32_4 = arith.constant 1 : i32
    %20 = vector.broadcast %c1_i32_4 : i32 to vector<128x1xi32>
    %21 = arith.cmpi slt, %16, %20 : vector<128x1xi32>
    %c0_5 = arith.constant 0 : index
    %c0_6 = arith.constant 0 : index
    %22 = vector.load %arg2[%c0_5, %c0_6] : memref<144x128xf32, #tpu.memory_space<vmem>>, vector<4x16xf32>
    %c8 = arith.constant 8 : index
    %c0_7 = arith.constant 0 : index
    %23 = vector.load %arg2[%c8, %c0_7] : memref<144x128xf32, #tpu.memory_space<vmem>>, vector<4x16xf32>
    %c16 = arith.constant 16 : index
    %c0_8 = arith.constant 0 : index
    %24 = vector.load %arg2[%c16, %c0_8] : memref<144x128xf32, #tpu.memory_space<vmem>>, vector<4x16xf32>
    %c24 = arith.constant 24 : index
    %c0_9 = arith.constant 0 : index
    %25 = vector.load %arg2[%c24, %c0_9] : memref<144x128xf32, #tpu.memory_space<vmem>>, vector<1x16xf32>
    %cst = arith.constant dense<0.000000e+00> : vector<128x16xf32>
    %26 = tpu.matmul %17, %24, %cst {dimension_numbers = #tpu.dot_dimension_numbers<[1], [0], [0], [1], [0, 0, 1, 1], [], []>} : vector<128x4xf32>, vector<4x16xf32>, vector<128x16xf32> -> vector<128x16xf32>
    %cst_10 = arith.constant dense<0.000000e+00> : vector<128x16xf32>
    %27 = tpu.matmul %17, %22, %cst_10 {dimension_numbers = #tpu.dot_dimension_numbers<[1], [0], [0], [1], [0, 0, 1, 1], [], []>} : vector<128x4xf32>, vector<4x16xf32>, vector<128x16xf32> -> vector<128x16xf32>
    %c2_i32_11 = arith.constant 2 : i32
    %28 = tpu.dynamic_rotate %27 by %c2_i32_11 dim 0 : vector<128x16xf32>, i32 -> vector<128x16xf32>
    %cst_12 = arith.constant 0.000000e+00 : f32
    %29 = vector.shape_cast %19 : vector<128x1xi1> to vector<128x1xi1>
    %30 = vector.broadcast %29 : vector<128x1xi1> to vector<128x16xi1>
    %31 = vector.broadcast %cst_12 : f32 to vector<128x16xf32>
    %32 = arith.select %30, %31, %28 : vector<128x16xi1>, vector<128x16xf32>
    %33 = arith.addf %26, %32 : vector<128x16xf32>
    %cst_13 = arith.constant dense<0.000000e+00> : vector<128x16xf32>
    %34 = tpu.matmul %17, %23, %cst_13 {dimension_numbers = #tpu.dot_dimension_numbers<[1], [0], [0], [1], [0, 0, 1, 1], [], []>} : vector<128x4xf32>, vector<4x16xf32>, vector<128x16xf32> -> vector<128x16xf32>
    %c1_i32_14 = arith.constant 1 : i32
    %35 = tpu.dynamic_rotate %34 by %c1_i32_14 dim 0 : vector<128x16xf32>, i32 -> vector<128x16xf32>
    %cst_15 = arith.constant 0.000000e+00 : f32
    %36 = vector.shape_cast %21 : vector<128x1xi1> to vector<128x1xi1>
    %37 = vector.broadcast %36 : vector<128x1xi1> to vector<128x16xi1>
    %38 = vector.broadcast %cst_15 : f32 to vector<128x16xf32>
    %39 = arith.select %37, %38, %35 : vector<128x16xi1>, vector<128x16xf32>
    %40 = arith.addf %33, %39 : vector<128x16xf32>
    %41 = vector.broadcast %25 : vector<1x16xf32> to vector<128x16xf32>
    %42 = arith.addf %40, %41 : vector<128x16xf32>
    %43 = vector.extract_strided_slice %42 {offsets = [0, 0], sizes = [128, 8], strides = [1, 1]} : vector<128x16xf32> to vector<128x8xf32>
    %cst_16 = arith.constant 0.000000e+00 : f32
    %44 = vector.broadcast %cst_16 : f32 to vector<128x8xf32>
    %45 = arith.maximumf %43, %44 : vector<128x8xf32>
    %46 = vector.extract_strided_slice %42 {offsets = [0, 8], sizes = [128, 8], strides = [1, 1]} : vector<128x16xf32> to vector<128x8xf32>
    %c32 = arith.constant 32 : index
    %c0_17 = arith.constant 0 : index
    %47 = vector.load %arg2[%c32, %c0_17] : memref<144x128xf32, #tpu.memory_space<vmem>>, vector<8x8xf32>
    %c40 = arith.constant 40 : index
    %c0_18 = arith.constant 0 : index
    %48 = vector.load %arg2[%c40, %c0_18] : memref<144x128xf32, #tpu.memory_space<vmem>>, vector<8x8xf32>
    %c48 = arith.constant 48 : index
    %c0_19 = arith.constant 0 : index
    %49 = vector.load %arg2[%c48, %c0_19] : memref<144x128xf32, #tpu.memory_space<vmem>>, vector<8x8xf32>
    %c56 = arith.constant 56 : index
    %c0_20 = arith.constant 0 : index
    %50 = vector.load %arg2[%c56, %c0_20] : memref<144x128xf32, #tpu.memory_space<vmem>>, vector<1x8xf32>
    %cst_21 = arith.constant dense<0.000000e+00> : vector<128x8xf32>
    %51 = tpu.matmul %45, %49, %cst_21 {dimension_numbers = #tpu.dot_dimension_numbers<[1], [0], [0], [1], [0, 0, 1, 1], [], []>} : vector<128x8xf32>, vector<8x8xf32>, vector<128x8xf32> -> vector<128x8xf32>
    %cst_22 = arith.constant dense<0.000000e+00> : vector<128x8xf32>
    %52 = tpu.matmul %45, %47, %cst_22 {dimension_numbers = #tpu.dot_dimension_numbers<[1], [0], [0], [1], [0, 0, 1, 1], [], []>} : vector<128x8xf32>, vector<8x8xf32>, vector<128x8xf32> -> vector<128x8xf32>
    %c2_i32_23 = arith.constant 2 : i32
    %53 = tpu.dynamic_rotate %52 by %c2_i32_23 dim 0 : vector<128x8xf32>, i32 -> vector<128x8xf32>
    %cst_24 = arith.constant 0.000000e+00 : f32
    %54 = vector.shape_cast %19 : vector<128x1xi1> to vector<128x1xi1>
    %55 = vector.broadcast %54 : vector<128x1xi1> to vector<128x8xi1>
    %56 = vector.broadcast %cst_24 : f32 to vector<128x8xf32>
    %57 = arith.select %55, %56, %53 : vector<128x8xi1>, vector<128x8xf32>
    %58 = arith.addf %51, %57 : vector<128x8xf32>
    %cst_25 = arith.constant dense<0.000000e+00> : vector<128x8xf32>
    %59 = tpu.matmul %45, %48, %cst_25 {dimension_numbers = #tpu.dot_dimension_numbers<[1], [0], [0], [1], [0, 0, 1, 1], [], []>} : vector<128x8xf32>, vector<8x8xf32>, vector<128x8xf32> -> vector<128x8xf32>
    %c1_i32_26 = arith.constant 1 : i32
    %60 = tpu.dynamic_rotate %59 by %c1_i32_26 dim 0 : vector<128x8xf32>, i32 -> vector<128x8xf32>
    %cst_27 = arith.constant 0.000000e+00 : f32
    %61 = vector.shape_cast %21 : vector<128x1xi1> to vector<128x1xi1>
    %62 = vector.broadcast %61 : vector<128x1xi1> to vector<128x8xi1>
    %63 = vector.broadcast %cst_27 : f32 to vector<128x8xf32>
    %64 = arith.select %62, %63, %60 : vector<128x8xi1>, vector<128x8xf32>
    %65 = arith.addf %58, %64 : vector<128x8xf32>
    %66 = vector.broadcast %50 : vector<1x8xf32> to vector<128x8xf32>
    %67 = arith.addf %65, %66 : vector<128x8xf32>
    %cst_28 = arith.constant 0.000000e+00 : f32
    %68 = vector.broadcast %cst_28 : f32 to vector<128x8xf32>
    %69 = arith.maximumf %67, %68 : vector<128x8xf32>
    %70 = arith.addf %69, %46 : vector<128x8xf32>
    %cst_29 = arith.constant 0.000000e+00 : f32
    %71 = vector.broadcast %cst_29 : f32 to vector<128x8xf32>
    %72 = arith.maximumf %70, %71 : vector<128x8xf32>
    %c4_i32 = arith.constant 4 : i32
    %73 = vector.broadcast %c4_i32 : i32 to vector<128x1xi32>
    %74 = arith.cmpi slt, %16, %73 : vector<128x1xi32>
    %c2_i32_30 = arith.constant 2 : i32
    %75 = vector.broadcast %c2_i32_30 : i32 to vector<128x1xi32>
    %76 = arith.cmpi slt, %16, %75 : vector<128x1xi32>
    %c64 = arith.constant 64 : index
    %c0_31 = arith.constant 0 : index
    %77 = vector.load %arg2[%c64, %c0_31] : memref<144x128xf32, #tpu.memory_space<vmem>>, vector<8x8xf32>
    %c72 = arith.constant 72 : index
    %c0_32 = arith.constant 0 : index
    %78 = vector.load %arg2[%c72, %c0_32] : memref<144x128xf32, #tpu.memory_space<vmem>>, vector<8x8xf32>
    %c80 = arith.constant 80 : index
    %c0_33 = arith.constant 0 : index
    %79 = vector.load %arg2[%c80, %c0_33] : memref<144x128xf32, #tpu.memory_space<vmem>>, vector<8x8xf32>
    %c88 = arith.constant 88 : index
    %c0_34 = arith.constant 0 : index
    %80 = vector.load %arg2[%c88, %c0_34] : memref<144x128xf32, #tpu.memory_space<vmem>>, vector<1x8xf32>
    %cst_35 = arith.constant dense<0.000000e+00> : vector<128x8xf32>
    %81 = tpu.matmul %72, %79, %cst_35 {dimension_numbers = #tpu.dot_dimension_numbers<[1], [0], [0], [1], [0, 0, 1, 1], [], []>} : vector<128x8xf32>, vector<8x8xf32>, vector<128x8xf32> -> vector<128x8xf32>
    %cst_36 = arith.constant dense<0.000000e+00> : vector<128x8xf32>
    %82 = tpu.matmul %72, %77, %cst_36 {dimension_numbers = #tpu.dot_dimension_numbers<[1], [0], [0], [1], [0, 0, 1, 1], [], []>} : vector<128x8xf32>, vector<8x8xf32>, vector<128x8xf32> -> vector<128x8xf32>
    %c4_i32_37 = arith.constant 4 : i32
    %83 = tpu.dynamic_rotate %82 by %c4_i32_37 dim 0 : vector<128x8xf32>, i32 -> vector<128x8xf32>
    %cst_38 = arith.constant 0.000000e+00 : f32
    %84 = vector.shape_cast %74 : vector<128x1xi1> to vector<128x1xi1>
    %85 = vector.broadcast %84 : vector<128x1xi1> to vector<128x8xi1>
    %86 = vector.broadcast %cst_38 : f32 to vector<128x8xf32>
    %87 = arith.select %85, %86, %83 : vector<128x8xi1>, vector<128x8xf32>
    %88 = arith.addf %81, %87 : vector<128x8xf32>
    %cst_39 = arith.constant dense<0.000000e+00> : vector<128x8xf32>
    %89 = tpu.matmul %72, %78, %cst_39 {dimension_numbers = #tpu.dot_dimension_numbers<[1], [0], [0], [1], [0, 0, 1, 1], [], []>} : vector<128x8xf32>, vector<8x8xf32>, vector<128x8xf32> -> vector<128x8xf32>
    %c2_i32_40 = arith.constant 2 : i32
    %90 = tpu.dynamic_rotate %89 by %c2_i32_40 dim 0 : vector<128x8xf32>, i32 -> vector<128x8xf32>
    %cst_41 = arith.constant 0.000000e+00 : f32
    %91 = vector.shape_cast %76 : vector<128x1xi1> to vector<128x1xi1>
    %92 = vector.broadcast %91 : vector<128x1xi1> to vector<128x8xi1>
    %93 = vector.broadcast %cst_41 : f32 to vector<128x8xf32>
    %94 = arith.select %92, %93, %90 : vector<128x8xi1>, vector<128x8xf32>
    %95 = arith.addf %88, %94 : vector<128x8xf32>
    %96 = vector.broadcast %80 : vector<1x8xf32> to vector<128x8xf32>
    %97 = arith.addf %95, %96 : vector<128x8xf32>
    %cst_42 = arith.constant 0.000000e+00 : f32
    %98 = vector.broadcast %cst_42 : f32 to vector<128x8xf32>
    %99 = arith.maximumf %97, %98 : vector<128x8xf32>
    %c96 = arith.constant 96 : index
    %c0_43 = arith.constant 0 : index
    %100 = vector.load %arg2[%c96, %c0_43] : memref<144x128xf32, #tpu.memory_space<vmem>>, vector<8x8xf32>
    %c104 = arith.constant 104 : index
    %c0_44 = arith.constant 0 : index
    %101 = vector.load %arg2[%c104, %c0_44] : memref<144x128xf32, #tpu.memory_space<vmem>>, vector<8x8xf32>
    %c112 = arith.constant 112 : index
    %c0_45 = arith.constant 0 : index
    %102 = vector.load %arg2[%c112, %c0_45] : memref<144x128xf32, #tpu.memory_space<vmem>>, vector<8x8xf32>
    %c120 = arith.constant 120 : index
    %c0_46 = arith.constant 0 : index
    %103 = vector.load %arg2[%c120, %c0_46] : memref<144x128xf32, #tpu.memory_space<vmem>>, vector<1x8xf32>
    %cst_47 = arith.constant dense<0.000000e+00> : vector<128x8xf32>
    %104 = tpu.matmul %99, %102, %cst_47 {dimension_numbers = #tpu.dot_dimension_numbers<[1], [0], [0], [1], [0, 0, 1, 1], [], []>} : vector<128x8xf32>, vector<8x8xf32>, vector<128x8xf32> -> vector<128x8xf32>
    %cst_48 = arith.constant dense<0.000000e+00> : vector<128x8xf32>
    %105 = tpu.matmul %99, %100, %cst_48 {dimension_numbers = #tpu.dot_dimension_numbers<[1], [0], [0], [1], [0, 0, 1, 1], [], []>} : vector<128x8xf32>, vector<8x8xf32>, vector<128x8xf32> -> vector<128x8xf32>
    %c4_i32_49 = arith.constant 4 : i32
    %106 = tpu.dynamic_rotate %105 by %c4_i32_49 dim 0 : vector<128x8xf32>, i32 -> vector<128x8xf32>
    %cst_50 = arith.constant 0.000000e+00 : f32
    %107 = vector.shape_cast %74 : vector<128x1xi1> to vector<128x1xi1>
    %108 = vector.broadcast %107 : vector<128x1xi1> to vector<128x8xi1>
    %109 = vector.broadcast %cst_50 : f32 to vector<128x8xf32>
    %110 = arith.select %108, %109, %106 : vector<128x8xi1>, vector<128x8xf32>
    %111 = arith.addf %104, %110 : vector<128x8xf32>
    %cst_51 = arith.constant dense<0.000000e+00> : vector<128x8xf32>
    %112 = tpu.matmul %99, %101, %cst_51 {dimension_numbers = #tpu.dot_dimension_numbers<[1], [0], [0], [1], [0, 0, 1, 1], [], []>} : vector<128x8xf32>, vector<8x8xf32>, vector<128x8xf32> -> vector<128x8xf32>
    %c2_i32_52 = arith.constant 2 : i32
    %113 = tpu.dynamic_rotate %112 by %c2_i32_52 dim 0 : vector<128x8xf32>, i32 -> vector<128x8xf32>
    %cst_53 = arith.constant 0.000000e+00 : f32
    %114 = vector.shape_cast %76 : vector<128x1xi1> to vector<128x1xi1>
    %115 = vector.broadcast %114 : vector<128x1xi1> to vector<128x8xi1>
    %116 = vector.broadcast %cst_53 : f32 to vector<128x8xf32>
    %117 = arith.select %115, %116, %113 : vector<128x8xi1>, vector<128x8xf32>
    %118 = arith.addf %111, %117 : vector<128x8xf32>
    %119 = vector.broadcast %103 : vector<1x8xf32> to vector<128x8xf32>
    %120 = arith.addf %118, %119 : vector<128x8xf32>
    %cst_54 = arith.constant 0.000000e+00 : f32
    %121 = vector.broadcast %cst_54 : f32 to vector<128x8xf32>
    %122 = arith.maximumf %120, %121 : vector<128x8xf32>
    %123 = arith.addf %122, %72 : vector<128x8xf32>
    %cst_55 = arith.constant 0.000000e+00 : f32
    %124 = vector.broadcast %cst_55 : f32 to vector<128x8xf32>
    %125 = arith.maximumf %123, %124 : vector<128x8xf32>
    %c0_56 = arith.constant 0 : index
    %c0_57 = arith.constant 0 : index
    %126 = vector.load %arg4[%c0_56, %c0_57] : memref<128x8xf32, #tpu.memory_space<vmem>>, vector<128x8xf32>
    tpu.vector_store %arg4[%c0_56, %c0_57], %125 {strides = array<i32>} : memref<128x8xf32, #tpu.memory_space<vmem>>, vector<128x8xf32>,
    %c15 = arith.constant 15 : index
    %c0_58 = arith.constant 0 : index
    %127 = tpu.strided_load %arg4[%c15, %c0_58] {strides = array<i32: 16, 1>} : memref<128x8xf32, #tpu.memory_space<vmem>>, vector<8x8xf32>
    %c128 = arith.constant 128 : index
    %c0_59 = arith.constant 0 : index
    %128 = vector.load %arg2[%c128, %c0_59] : memref<144x128xf32, #tpu.memory_space<vmem>>, vector<8x128xf32>
    %c136 = arith.constant 136 : index
    %c0_60 = arith.constant 0 : index
    %129 = vector.load %arg2[%c136, %c0_60] : memref<144x128xf32, #tpu.memory_space<vmem>>, vector<1x128xf32>
    %cst_61 = arith.constant dense<0.000000e+00> : vector<8x128xf32>
    %130 = tpu.matmul %127, %128, %cst_61 {dimension_numbers = #tpu.dot_dimension_numbers<[1], [0], [0], [1], [0, 0, 1, 1], [], []>} : vector<8x8xf32>, vector<8x128xf32>, vector<8x128xf32> -> vector<8x128xf32>
    %131 = vector.broadcast %129 : vector<1x128xf32> to vector<8x128xf32>
    %132 = arith.addf %130, %131 : vector<8x128xf32>
    %c0_62 = arith.constant 0 : index
    %c0_63 = arith.constant 0 : index
    %133 = vector.load %arg3[%c0_62, %c0_63] : memref<8x128xf32, #tpu.memory_space<vmem>>, vector<8x128xf32>
    tpu.vector_store %arg3[%c0_62, %c0_63], %132 {strides = array<i32>} : memref<8x128xf32, #tpu.memory_space<vmem>>, vector<8x128xf32>,
    return
  }
  func.func @transform_0(%arg0: i32) -> (i32, i32) {
    %c0_i32 = arith.constant 0 : i32
    %c0_i32_0 = arith.constant 0 : i32
    return %arg0, %c0_i32 : i32, i32
  }
  func.func @transform_1(%arg0: i32) -> (i32, i32) {
    %c0_i32 = arith.constant 0 : i32
    %c0_i32_0 = arith.constant 0 : i32
    %c0_i32_1 = arith.constant 0 : i32
    return %c0_i32, %c0_i32_0 : i32, i32
  }
  func.func @transform_2(%arg0: i32) -> (i32, i32) {
    %c0_i32 = arith.constant 0 : i32
    %c0_i32_0 = arith.constant 0 : i32
    return %arg0, %c0_i32 : i32, i32
  }
}

</mosaic_0001>

<bundles_post_ra>
// kernel: tpu_custom_call.1
= control target key start
LH: loop header
LB: loop body
LE: loop exit
PB: predicated region body
PF: predicated region fallthrough
CT: control target
= control target key end

     0   :  { %7 = vsyncpa [#allocation4], 0  ;;  %s5097_s0 = inlined_call_operand.vmem [shape: f32[128,4], index: 0, kind: input, shape index: {}]   ;;  %s5098_s1 = inlined_call_operand.hbm [shape: f32[144,128], index: 1, kind: input, shape index: {}]   ;;  %s5099_s2 = inlined_call_operand.hbm [shape: f32[8,128], index: 2, kind: output, shape index: {}]  }
   0x1   :  { %8 = vsyncpa [#allocation5], 0  ;;  %s3976_s9 = smov [#allocation3]   ;;  %s3928_s13 = scalar_lea.hbm %s5098_s1, 2304 }
   0x2   :  { %s16_s10 = sshll.u32 %s3976_s9, 4  ;;  %p3929_p0 = scmp.ne.s32.totalorder %s5098_s1, %s3928_s13  ;;  %s17_s10 = int_to_ptr.vmem [resolvable:$true] %s16_s10 }
   0x3   :  { %p3932_p1 = scmp.lt.u32.totalorder %s3928_s13, %s5098_s1 }
   0x5   :  { %p3934_p2 = pnand %p3932_p1, %p3929_p0 }
   0x7   :  { %3937 = shalt.err (!%p3934_p2)
}
   0x8   :  { %s3938_s18 = scalar_lea.vmem %s17_s10, 2304  ;;  %p3943_p4 = scmp.lt.s32.totalorder %s17_s10, %s17_s10 }
   0x9   :  { %p3939_p3 = scmp.ne.s32.totalorder %s17_s10, %s3938_s18  ;;  %p3944_p5 = scmp.lt.s32.totalorder %s3938_s18, %s3938_s18 }
   0xb   :  { %p3945_p6 = por %p3944_p5, %p3943_p4 }
   0xd   :  { %p3946_p7 = pnand %p3945_p6, %p3939_p3 }
   0xf   :  { %3949 = shalt.err (!%p3946_p7)
}
  0x10   :  { %s3977_s19 = smov 128   ;;  %s3978_s20 = smov 8  }
  0x11   :  { %22 = dma.hbm_to_vmem [thread:$0]  %s5098_s1, 2304, %s17_s10, [#allocation4], %s3977_s19, %s3977_s19, %s3978_s20  }
  0x12   :  { %3972 = dma.done.wait [#allocation4], 2304  }
  0x13   :  { %3973 = vsyncadd [#allocation4], 4294964992  ;;  %vm336_vm0 = vcmask 1043456   ;;  %vm287_vm1 = vcmask 31744   ;;  %v283_v0 = vld [vmem:[#allocation3] sm:$0xf]  ;;  %v26_v22 = vlaneseq }
  0x14   :  { %v235_v1 = vld [vmem:[%s5097_s0] sm:$0xff]  ;;  %v236_v2 = vld [vmem:[%s5097_s0 + $0x8] sm:$0xff]  ;;  %3604 = vmatprep.subr.msk.mxu0 %vm336_vm0, %v283_v0  ;;  %v285_v4 = vld [vmem:[#allocation3 + $0x10] sm:$0xf]  ;;  %s3982_s26 = smov [#allocation6]  }
  0x15   :  { %3606 = vmatprep.mubr.msk.f32.mxu0 %vm287_vm1, %v235_v1  ;;  %v284_v3 = vld [vmem:[#allocation3 + $0x8] sm:$0xf]  ;;  %v237_v5 = vld [vmem:[%s5097_s0 + $0x10] sm:$0xff]  ;;  %3605 = vmatpush3.msk.msra.mxu0 %vm336_vm0, %v283_v0  ;;  %v238_v6 = vld [vmem:[%s5097_s0 + $0x18] sm:$0xff]  ;;  %v4115_v23 = vshrl.u32 %v26_v22, 7  ;;  %s3188_s1 = sshll.u32 %s3982_s26, 4  ;;  %s3189_s1 = int_to_ptr.vmem [resolvable:$true] %s3188_s1 }
  0x16   :  { %3630 = vmatprep.subr.msk.mxu1 %vm336_vm0, %v285_v4  ;;  %3607 = vmatmul.mubr.msk.f32.vlgmr.msra.gmra.mrb[0].mxu0 %vm287_vm1, %v236_v2  ;;  %v239_v7 = vld [vmem:[%s5097_s0 + $0x20] sm:$0xff]  ;;  %v240_v8 = vld [vmem:[%s5097_s0 + $0x28] sm:$0xff]  ;;  %v241_v9 = vld [vmem:[%s5097_s0 + $0x30] sm:$0xff]  ;;  %s3950_s27 = scalar_lea.vmem %s3189_s1, 128  ;;  %p3955_p9 = scmp.lt.s32.totalorder %s3189_s1, %s3189_s1 }
  0x17   :  { %3656 = vmatprep.subr.msk.mxu0 %vm336_vm0, %v284_v3  ;;  %3609 = vmatprep.mubr.msk.f32.mxu0 %vm287_vm1, %v237_v5  ;;  %v242_v10 = vld [vmem:[%s5097_s0 + $0x38] sm:$0xff]  ;;  %v243_v11 = vld [vmem:[%s5097_s0 + $0x40] sm:$0xff]  ;;  %v244_v12 = vld [vmem:[%s5097_s0 + $0x48] sm:$0xff]  ;;  %v29_v24 = vadd.s32 16, %v4115_v23  ;;  %vm501_vm2 = vcmp.lt.s32.totalorder %v4115_v23, 2  ;;  %v31_v28 = vadd.s32 32, %v4115_v23  ;;  %p3951_p8 = scmp.ne.s32.totalorder %s3189_s1, %s3950_s27  ;;  %p3956_p10 = scmp.lt.s32.totalorder %s3950_s27, %s3950_s27 }
  0x18   :  { %3657 = vmatpush3.msk.msra.mxu0 %vm336_vm0, %v284_v3  ;;  %3631 = vmatpush3.msk.msra.mxu1 %vm336_vm0, %v285_v4  ;;  %v245_v13 = vld [vmem:[%s5097_s0 + $0x50] sm:$0xff]  ;;  %v246_v14 = vld [vmem:[%s5097_s0 + $0x58] sm:$0xff]  ;;  %v247_v15 = vld [vmem:[%s5097_s0 + $0x60] sm:$0xff]  ;;  %v33_v40 = vadd.s32 48, %v4115_v23  ;;  %v35_v53 = vadd.s32 64, %v4115_v23  ;;  %v37_v63 = vadd.s32 80, %v4115_v23 }
  0x19   :  { %3632 = vmatprep.mubr.msk.f32.mxu1 %vm287_vm1, %v235_v1  ;;  %v248_v16 = vld [vmem:[%s5097_s0 + $0x68] sm:$0xff]  ;;  %v249_v17 = vld [vmem:[%s5097_s0 + $0x70] sm:$0xff]  ;;  %v250_v18 = vld [vmem:[%s5097_s0 + $0x78] sm:$0xff]  ;;  %v4123_v30 = vand.u32 15, %v29_v24  ;;  %v4133_v38 = vand.u32 15, %v31_v28  ;;  %vm878_vm11 = vcmp.lt.s32.totalorder %v4115_v23, 1  ;;  %p3957_p11 = por %p3956_p10, %p3955_p9 }
  0x1a   :  { %3633 = vmatmul.mubr.msk.f32.vlgmr.msra.gmra.mrb[0].mxu1 %vm287_vm1, %v236_v2  ;;  %3610 = vmatmul.mubr.msk.f32.gmra.mrb[2].mxu0 %vm287_vm1, %v238_v6  ;;  %v995_v19 = vld [vmem:[#allocation3 + $0x20] sm:$0xff]  ;;  %v997_v20 = vld [vmem:[#allocation3 + $0x30] sm:$0xff]  ;;  %v4112_v21 = vld [vmem:[#allocation3 + $0x28] sm:$0xff]  ;;  %v4148_v52 = vand.u32 15, %v33_v40  ;;  %s3979_s0 = smov 120  }
  0x1b   :  { %3635 = vmatprep.mubr.msk.f32.mxu1 %vm287_vm1, %v237_v5  ;;  %3612 = vmatprep.mubr.msk.f32.mxu0 %vm287_vm1, %v239_v7  ;;  %vm253_vm3 = vcmp.lt.s32.totalorder %v4123_v30, 2  ;;  %vm255_vm4 = vcmp.lt.s32.totalorder %v4133_v38, 2  ;;  %vm269_vm12 = vcmp.lt.s32.totalorder %v4123_v30, 1  ;;  %vm271_vm13 = vcmp.lt.s32.totalorder %v4133_v38, 1  ;;  %p3958_p12 = pnand %p3957_p11, %p3951_p8 }
  0x1c   :  { %3682 = vmatprep.subr.mxu1 %v995_v19  ;;  %3708 = vmatprep.subr.mxu0 %v997_v20  ;;  %vm257_vm5 = vcmp.lt.s32.totalorder %v4148_v52, 2  ;;  %vm273_vm14 = vcmp.lt.s32.totalorder %v4148_v52, 1 }
  0x1d   :  { %3683 = vmatpush3.msra.mxu1 %v995_v19 }
  0x1e   :  { %3636 = vmatmul.mubr.msk.f32.gmra.mrb[2].mxu1 %vm287_vm1, %v238_v6  ;;  %3613 = vmatmul.mubr.msk.f32.gmra.mrb[4].mxu0 %vm287_vm1, %v240_v8 }
  0x1f   :  { %3638 = vmatprep.mubr.msk.f32.mxu1 %vm287_vm1, %v239_v7  ;;  %3615 = vmatprep.mubr.msk.f32.mxu0 %vm287_vm1, %v241_v9 }
  0x20   :  { %3734 = vmatprep.subr.mxu1 %v4112_v21 }
  0x22   :  { %3639 = vmatmul.mubr.msk.f32.gmra.mrb[4].mxu1 %vm287_vm1, %v240_v8  ;;  %3616 = vmatmul.mubr.msk.f32.gmra.mrb[6].mxu0 %vm287_vm1, %v242_v10 }
  0x23   :  { %3641 = vmatprep.mubr.msk.f32.mxu1 %vm287_vm1, %v241_v9  ;;  %3618 = vmatprep.mubr.msk.f32.mxu0 %vm287_vm1, %v243_v11 }
  0x26   :  { %3642 = vmatmul.mubr.msk.f32.gmra.mrb[6].mxu1 %vm287_vm1, %v242_v10  ;;  %3619 = vmatmul.mubr.msk.f32.gmra.mrb[8].mxu0 %vm287_vm1, %v244_v12 }
  0x27   :  { %3644 = vmatprep.mubr.msk.f32.mxu1 %vm287_vm1, %v243_v11  ;;  %3621 = vmatprep.mubr.msk.f32.mxu0 %vm287_vm1, %v245_v13 }
  0x2a   :  { %3645 = vmatmul.mubr.msk.f32.gmra.mrb[8].mxu1 %vm287_vm1, %v244_v12  ;;  %3622 = vmatmul.mubr.msk.f32.gmra.mrb[10].mxu0 %vm287_vm1, %v246_v14 }
  0x2b   :  { %3647 = vmatprep.mubr.msk.f32.mxu1 %vm287_vm1, %v245_v13  ;;  %3624 = vmatprep.mubr.msk.f32.mxu0 %vm287_vm1, %v247_v15 }
  0x2e   :  { %3648 = vmatmul.mubr.msk.f32.gmra.mrb[10].mxu1 %vm287_vm1, %v246_v14  ;;  %3625 = vmatmul.mubr.msk.f32.gmra.mrb[12].mxu0 %vm287_vm1, %v248_v16 }
  0x2f   :  { %3650 = vmatprep.mubr.msk.f32.mxu1 %vm287_vm1, %v247_v15  ;;  %3627 = vmatprep.mubr.msk.f32.mxu0 %vm287_vm1, %v249_v17 }
  0x32   :  { %3651 = vmatmul.mubr.msk.f32.gmra.mrb[12].mxu1 %vm287_vm1, %v248_v16  ;;  %3628 = vmatmul.mubr.msk.f32.gmra.mrb[14].mxu0 %vm287_vm1, %v250_v18 }
  0x33   :  { %3653 = vmatprep.mubr.msk.f32.mxu1 %vm287_vm1, %v249_v17  ;;  %3658 = vmatprep.mubr.msk.f32.mxu0 %vm287_vm1, %v235_v1 }
  0x36   :  { %3654 = vmatmul.mubr.msk.f32.gmra.mrb[14].mxu1 %vm287_vm1, %v250_v18  ;;  %3659 = vmatmul.mubr.msk.f32.vlgmr.msra.gmra.mrb[16].mxu0 %vm287_vm1, %v236_v2  ;;  %v4163_v2 = vand.u32 15, %v35_v53 }
  0x37   :  { %3661 = vmatprep.mubr.msk.f32.mxu0 %vm287_vm1, %v237_v5  ;;  %3709 = vmatpush3.msra.mxu0 %v997_v20 }
  0x38   :  { %vm259_vm6 = vcmp.lt.s32.totalorder %v4163_v2, 2  ;;  %vm5101_vm15 = vcmp.lt.s32.totalorder %v4163_v2, 1 }
  0x3a   :  { %3662 = vmatmul.mubr.msk.f32.gmra.mrb[18].mxu0 %vm287_vm1, %v238_v6 }
  0x3b   :  { %3664 = vmatprep.mubr.msk.f32.mxu0 %vm287_vm1, %v239_v7 }
  0x3e   :  { %3665 = vmatmul.mubr.msk.f32.gmra.mrb[20].mxu0 %vm287_vm1, %v240_v8 }
  0x3f   :  { %3667 = vmatprep.mubr.msk.f32.mxu0 %vm287_vm1, %v241_v9 }
  0x42   :  { %3668 = vmatmul.mubr.msk.f32.gmra.mrb[22].mxu0 %vm287_vm1, %v242_v10 }
  0x43   :  { %3670 = vmatprep.mubr.msk.f32.mxu0 %vm287_vm1, %v243_v11 }
  0x46   :  { %3671 = vmatmul.mubr.msk.f32.gmra.mrb[24].mxu0 %vm287_vm1, %v244_v12  ;;  %v4173_v12 = vand.u32 15, %v37_v63 }
  0x47   :  { %3673 = vmatprep.mubr.msk.f32.mxu0 %vm287_vm1, %v245_v13 }
  0x48   :  { %vm261_vm7 = vcmp.lt.s32.totalorder %v4173_v12, 2  ;;  %vm5100_vm0 = vcmp.lt.s32.totalorder %v4173_v12, 1 }
  0x4a   :  { %3674 = vmatmul.mubr.msk.f32.gmra.mrb[26].mxu0 %vm287_vm1, %v246_v14 }
  0x4b   :  { %3676 = vmatprep.mubr.msk.f32.mxu0 %vm287_vm1, %v247_v15  ;;  %v39_v15 = vadd.s32 96, %v4115_v23 }
  0x4e   :  { %3677 = vmatmul.mubr.msk.f32.gmra.mrb[28].mxu0 %vm287_vm1, %v248_v16 }
  0x4f   :  { %3679 = vmatprep.mubr.msk.f32.mxu0 %vm287_vm1, %v249_v17 }
  0x52   :  { %3680 = vmatmul.mubr.msk.f32.gmra.mrb[30].mxu0 %vm287_vm1, %v250_v18 }
  0xe9   :  { %v3608_v25 = vpop.f32.mrb[0].mxu0 }
  0xea   :  { %v486_v26 = vrot.slane %v3608_v25, 6  ;;  %v4118_v27 = vpop.f32.mrb[1].mxu0 }
  0xeb   :  { %v485_v29 = vrot.slane %v4118_v27, 6 }
  0xed   :  { %v3634_v31 = vpop.f32.mrb[0].mxu1  ;;  %v3611_v32 = vpop.f32.mrb[2].mxu0  ;;  %v516_v33 = vsel %vm501_vm2, %v485_v29, %v486_v26 }
  0xee   :  { %v4129_v34 = vpop.f32.mrb[1].mxu1  ;;  %v488_v35 = vrot.slane %v3611_v32, 6  ;;  %v4131_v36 = vadd.f32 %v3634_v31, %v516_v33  ;;  %v416_v37 = vpop.f32.mrb[3].mxu0  ;;  %v4190_v32 = vand.u32 15, %v39_v15  ;;  %v41_v33 = vadd.s32 112, %v4115_v23 }
  0xef   :  { %v487_v39 = vrot.slane %v416_v37, 6 }
  0xf0   :  { %vm263_vm8 = vcmp.lt.s32.totalorder %v4190_v32, 2  ;;  %vm5102_vm1 = vcmp.lt.s32.totalorder %v4190_v32, 1 }
  0xf1   :  { %v3637_v41 = vpop.f32.mrb[2].mxu1  ;;  %v3614_v42 = vpop.f32.mrb[4].mxu0  ;;  %v514_v43 = vsel %vm501_vm2, %v487_v39, %v488_v35  ;;  %v515_v44 = vsel %vm501_vm2, %v486_v26, %v487_v39 }
  0xf2   :  { %v645_v45 = vpop.f32.mrb[3].mxu1  ;;  %v490_v46 = vrot.slane %v3614_v42, 6  ;;  %v4141_v47 = vadd.f32 %v3637_v41, %v514_v43  ;;  %v426_v48 = vpop.f32.mrb[5].mxu0  ;;  %v552_v49 = vsel %vm253_vm3, 0.0, %v515_v44 }
  0xf3   :  { %v489_v50 = vrot.slane %v426_v48, 6  ;;  %v4146_v51 = vadd.f32 %v645_v45, %v552_v49 }
  0xf5   :  { %v3640_v54 = vpop.f32.mrb[4].mxu1  ;;  %v3617_v55 = vpop.f32.mrb[6].mxu0  ;;  %v512_v56 = vsel %vm501_vm2, %v489_v50, %v490_v46  ;;  %v513_v57 = vsel %vm501_vm2, %v488_v35, %v489_v50  ;;  %v4207_v50 = vand.u32 15, %v41_v33 }
  0xf6   :  { %v655_v58 = vpop.f32.mrb[5].mxu1  ;;  %v492_v59 = vrot.slane %v3617_v55, 6  ;;  %v4155_v60 = vadd.f32 %v3640_v54, %v512_v56  ;;  %v436_v61 = vpop.f32.mrb[7].mxu0  ;;  %v554_v62 = vsel %vm255_vm4, 0.0, %v513_v57 }
  0xf7   :  { %v491_v0 = vrot.slane %v436_v61, 6  ;;  %v4160_v1 = vadd.f32 %v655_v58, %v554_v62  ;;  %vm265_vm10 = vcmp.lt.s32.totalorder %v4207_v50, 2 }
  0xf9   :  { %v3643_v3 = vpop.f32.mrb[6].mxu1  ;;  %v3620_v4 = vpop.f32.mrb[8].mxu0  ;;  %v510_v5 = vsel %vm501_vm2, %v491_v0, %v492_v59  ;;  %v511_v6 = vsel %vm501_vm2, %v490_v46, %v491_v0  ;;  %v4202_v46 = vand.u32 15, %v4115_v23 }
  0xfa   :  { %v665_v7 = vpop.f32.mrb[7].mxu1  ;;  %v494_v8 = vrot.slane %v3620_v4, 6  ;;  %v4169_v9 = vadd.f32 %v3643_v3, %v510_v5  ;;  %v446_v10 = vpop.f32.mrb[9].mxu0  ;;  %v556_v11 = vsel %vm257_vm5, 0.0, %v511_v6 }
  0xfb   :  { %v493_v13 = vrot.slane %v446_v10, 6  ;;  %v4175_v14 = vadd.f32 %v665_v7, %v556_v11  ;;  %vm251_vm9 = vcmp.lt.s32.totalorder %v4202_v46, 2 }
  0xfd   :  { %v3646_v16 = vpop.f32.mrb[8].mxu1  ;;  %v3623_v17 = vpop.f32.mrb[10].mxu0  ;;  %v508_v18 = vsel %vm501_vm2, %v493_v13, %v494_v8  ;;  %v509_v19 = vsel %vm501_vm2, %v492_v59, %v493_v13 }
  0xfe   :  { %v675_v20 = vpop.f32.mrb[9].mxu1  ;;  %v496_v22 = vrot.slane %v3623_v17, 6  ;;  %v4183_v24 = vadd.f32 %v3646_v16, %v508_v18  ;;  %v456_v25 = vpop.f32.mrb[11].mxu0  ;;  %v558_v26 = vsel %vm259_vm6, 0.0, %v509_v19 }
  0xff   :  { %v495_v28 = vrot.slane %v456_v25, 6  ;;  %v4188_v31 = vadd.f32 %v675_v20, %v558_v26 }
 0x101   :  { %v3649_v35 = vpop.f32.mrb[10].mxu1  ;;  %v3626_v37 = vpop.f32.mrb[12].mxu0  ;;  %v506_v39 = vsel %vm501_vm2, %v495_v28, %v496_v22  ;;  %v507_v40 = vsel %vm501_vm2, %v494_v8, %v495_v28 }
 0x102   :  { %v685_v41 = vpop.f32.mrb[11].mxu1  ;;  %v498_v42 = vrot.slane %v3626_v37, 6  ;;  %v4197_v43 = vadd.f32 %v3649_v35, %v506_v39  ;;  %v466_v44 = vpop.f32.mrb[13].mxu0  ;;  %v560_v45 = vsel %vm261_vm7, 0.0, %v507_v40 }
 0x103   :  { %v497_v48 = vrot.slane %v466_v44, 6  ;;  %v4204_v49 = vadd.f32 %v685_v41, %v560_v45 }
 0x105   :  { %v3652_v53 = vpop.f32.mrb[12].mxu1  ;;  %v3629_v54 = vpop.f32.mrb[14].mxu0  ;;  %v504_v55 = vsel %vm501_vm2, %v497_v48, %v498_v42  ;;  %v505_v56 = vsel %vm501_vm2, %v496_v22, %v497_v48 }
 0x106   :  { %v695_v57 = vpop.f32.mrb[13].mxu1  ;;  %v500_v58 = vrot.slane %v3629_v54, 6  ;;  %v4214_v59 = vadd.f32 %v3652_v53, %v504_v55  ;;  %v476_v61 = vpop.f32.mrb[15].mxu0  ;;  %v562_v62 = vsel %vm263_vm8, 0.0, %v505_v56 }
 0x107   :  { %v499_v63 = vrot.slane %v476_v61, 6  ;;  %v4218_v0 = vadd.f32 %v695_v57, %v562_v62 }
 0x108   :  { %v517_v3 = vsel %vm501_vm2, %v500_v58, %v485_v29 }
 0x109   :  { %v3655_v4 = vpop.f32.mrb[14].mxu1  ;;  %v550_v5 = vsel %vm251_vm9, 0.0, %v517_v3  ;;  %v502_v6 = vsel %vm501_vm2, %v499_v63, %v500_v58  ;;  %v3660_v7 = vpop.f32.mrb[16].mxu0  ;;  %v503_v8 = vsel %vm501_vm2, %v498_v42, %v499_v63  ;;  %v4261_v42 = vld [vmem:[#allocation3 + $0x18] ss:$0 sm:$0xff] }
 0x10a   :  { %v705_v10 = vpop.f32.mrb[15].mxu1  ;;  %v4232_v11 = vadd.f32 %v3655_v4, %v502_v6  ;;  %v863_v27 = vrot.slane %v3660_v7, 7  ;;  %v564_v29 = vsel %vm265_vm10, 0.0, %v503_v8  ;;  %v4236_v13 = vpop.f32.mrb[17].mxu0  ;;  %v4239_v15 = vadd.f32 %v4129_v34, %v550_v5 }
 0x10b   :  { %v4241_v16 = vadd.f32 %v705_v10, %v564_v29  ;;  %v862_v17 = vrot.slane %v4236_v13, 7 }
 0x10d   :  { %v893_v18 = vsel %vm878_vm11, %v862_v17, %v863_v27  ;;  %v3663_v19 = vpop.f32.mrb[18].mxu0 }
 0x10e   :  { %v4249_v20 = vadd.f32 %v893_v18, %v4131_v36  ;;  %v865_v22 = vrot.slane %v3663_v19, 7  ;;  %v793_v25 = vpop.f32.mrb[19].mxu0 }
 0x10f   :  { %v864_v26 = vrot.slane %v793_v25, 7 }
 0x111   :  { %v891_v34 = vsel %vm878_vm11, %v864_v26, %v865_v22  ;;  %v892_v28 = vsel %vm878_vm11, %v863_v27, %v864_v26  ;;  %v3666_v33 = vpop.f32.mrb[20].mxu0 }
 0x112   :  { %v867_v35 = vrot.slane %v3666_v33, 7  ;;  %v803_v37 = vpop.f32.mrb[21].mxu0  ;;  %v929_v39 = vsel %vm269_vm12, 0.0, %v892_v28  ;;  %v946_v36 = vadd.f32 %v891_v34, %v4141_v47 }
 0x113   :  { %v866_v40 = vrot.slane %v803_v37, 7  ;;  %v945_v41 = vadd.f32 %v929_v39, %v4146_v51 }
 0x114   :  { %v4284_v63 = vadd.f32 %v4261_v42, %v946_v36 }
 0x115   :  { %v889_v44 = vsel %vm878_vm11, %v866_v40, %v867_v35  ;;  %v890_v45 = vsel %vm878_vm11, %v865_v22, %v866_v40  ;;  %v3669_v48 = vpop.f32.mrb[22].mxu0  ;;  %v4268_v53 = vadd.f32 %v4261_v42, %v945_v41 }
 0x116   :  { %v931_v47 = vsel %vm271_vm13, 0.0, %v890_v45  ;;  %v869_v54 = vrot.slane %v3669_v48, 7  ;;  %v813_v55 = vpop.f32.mrb[23].mxu0  ;;  %v948_v56 = vadd.f32 %v889_v44, %v4155_v60 }
 0x117   :  { %v868_v51 = vrot.slane %v813_v55, 7  ;;  %1651 = vrot.lane.b32.xlu1 %v4268_v53, %s3979_s0  ;;  %v4277_v57 = vadd.f32 %v931_v47, %v4160_v1 }
 0x118   :  { %v4300_v27 = vadd.f32 %v4261_v42, %v948_v56 }
 0x119   :  { %v887_v58 = vsel %vm878_vm11, %v868_v51, %v869_v54  ;;  %v888_v61 = vsel %vm878_vm11, %v867_v35, %v868_v51  ;;  %v3672_v62 = vpop.f32.mrb[24].mxu0 }
 0x11a   :  { %v933_v60 = vsel %vm273_vm14, 0.0, %v888_v61  ;;  %v871_v3 = vrot.slane %v3672_v62, 7  ;;  %v823_v4 = vpop.f32.mrb[25].mxu0  ;;  %v950_v5 = vadd.f32 %v887_v58, %v4169_v9 }
 0x11b   :  { %v870_v1 = vrot.slane %v823_v4, 7  ;;  %1653 = vrot.lane.b32.xlu1 %v4284_v63, %s3979_s0  ;;  %v4293_v6 = vadd.f32 %v933_v60, %v4175_v14 }
 0x11c   :  { %v4316_v28 = vadd.f32 %v4261_v42, %v950_v5 }
 0x11d   :  { %v885_v7 = vsel %vm878_vm11, %v870_v1, %v871_v3  ;;  %v886_v8 = vsel %vm878_vm11, %v869_v54, %v870_v1  ;;  %v3675_v10 = vpop.f32.mrb[26].mxu0 }
 0x11e   :  { %v935_v9 = vsel %vm5101_vm15, 0.0, %v886_v8  ;;  %v873_v29 = vrot.slane %v3675_v10, 7  ;;  %v833_v18 = vpop.f32.mrb[27].mxu0  ;;  %v952_v19 = vadd.f32 %v885_v7, %v4183_v24  ;;  %vm281_vm15 = vcmp.lt.s32.totalorder %v4207_v50, 1 }
 0x11f   :  { %v872_v14 = vrot.slane %v833_v18, 7  ;;  %1657 = vrot.lane.b32.xlu1 %v4300_v27, %s3979_s0  ;;  %v4309_v22 = vadd.f32 %v935_v9, %v4188_v31 }
 0x120   :  { %v4330_v44 = vadd.f32 %v4261_v42, %v952_v19 }
 0x121   :  { %v883_v25 = vsel %vm878_vm11, %v872_v14, %v873_v29  ;;  %v884_v26 = vsel %vm878_vm11, %v871_v3, %v872_v14  ;;  %v3678_v34 = vpop.f32.mrb[28].mxu0 }
 0x122   :  { %v937_v24 = vsel %vm5100_vm0, 0.0, %v884_v26  ;;  %v875_v33 = vrot.slane %v3678_v34, 7  ;;  %v843_v35 = vpop.f32.mrb[29].mxu0  ;;  %v954_v37 = vadd.f32 %v883_v25, %v4197_v43  ;;  %vm267_vm0 = vcmp.lt.s32.totalorder %v4202_v46, 1  ;;  %v1743_v25 = vld [vmem:[#allocation3 + $0x40] sm:$0xff]  ;;  %v1745_v26 = vld [vmem:[#allocation3 + $0x50] sm:$0xff] }
 0x123   :  { %v874_v31 = vrot.slane %v843_v35, 7  ;;  %1661 = vrot.lane.b32.xlu1 %v4316_v28, %s3979_s0  ;;  %v953_v39 = vadd.f32 %v937_v24, %v4204_v49  ;;  %v988_v10 = vmax.f32 %v4330_v44, 0.0  ;;  %3760 = vmatprep.subr.mxu0 %v1743_v25  ;;  %v4450_v34 = vld [vmem:[#allocation3 + $0x48] sm:$0xff] }
 0x125   :  { %v881_v36 = vsel %vm878_vm11, %v874_v31, %v875_v33  ;;  %v882_v40 = vsel %vm878_vm11, %v873_v29, %v874_v31  ;;  %v3681_v41 = vpop.f32.mrb[30].mxu0  ;;  %v973_v8 = vadd.f32 %v4261_v42, %v953_v39 }
 0x126   :  { %v939_v43 = vsel %vm5102_vm1, 0.0, %v882_v40  ;;  %v877_v45 = vrot.slane %v3681_v41, 7  ;;  %v853_v48 = vpop.f32.mrb[31].mxu0  ;;  %v956_v47 = vadd.f32 %v881_v36, %v4214_v59  ;;  %v974_v59 = vadd.f32 %v4261_v42, %v954_v37 }
 0x127   :  { %v876_v49 = vrot.slane %v853_v48, 7  ;;  %1665 = vrot.lane.b32.xlu1 %v4330_v44, %s3979_s0  ;;  %v955_v54 = vadd.f32 %v939_v43, %v4218_v0  ;;  %vm999_vm1 = vcmask 64512  }
 0x128   :  { %v894_v55 = vsel %vm878_vm11, %v877_v45, %v862_v17  ;;  %v964_v17 = vadd.f32 %v4261_v42, %v4249_v20  ;;  %v976_v3 = vadd.f32 %v4261_v42, %v956_v47  ;;  %v982_v20 = vmax.f32 %v4284_v63, 0.0 }
 0x129   :  { %v879_v56 = vsel %vm878_vm11, %v876_v49, %v877_v45  ;;  %v880_v51 = vsel %vm878_vm11, %v875_v33, %v876_v49  ;;  %v927_v58 = vsel %vm267_vm0, 0.0, %v894_v55  ;;  %v984_v63 = vmax.f32 %v4300_v27, 0.0 }
 0x12a   :  { %v941_v61 = vsel %vm281_vm15, 0.0, %v880_v51  ;;  %v943_v0 = vadd.f32 %v927_v58, %v4239_v15  ;;  %v958_v13 = vadd.f32 %v879_v56, %v4232_v11  ;;  %v4364_v5 = vmax.f32 %v964_v17, 0.0 }
 0x12b   :  { %1669 = vrot.lane.b32.xlu1 %v974_v59, %s3979_s0  ;;  %v957_v62 = vadd.f32 %v941_v61, %v4241_v16  ;;  %v4368_v11 = vmax.f32 %v4268_v53, 0.0  ;;  %v967_v15 = vadd.f32 %v4261_v42, %v4277_v57  ;;  %v969_v57 = vadd.f32 %v4261_v42, %v4293_v6 }
 0x12c   :  { %v963_v60 = vadd.f32 %v4261_v42, %v943_v0  ;;  %v978_v16 = vadd.f32 %v4261_v42, %v958_v13  ;;  %v986_v6 = vmax.f32 %v4316_v28, 0.0  ;;  %v989_v27 = vmax.f32 %v973_v8, 0.0 }
 0x12d   :  { %v983_v53 = vmax.f32 %v967_v15, 0.0  ;;  %v985_v1 = vmax.f32 %v969_v57, 0.0  ;;  %v975_v9 = vadd.f32 %v4261_v42, %v955_v54  ;;  %v990_v29 = vmax.f32 %v974_v59, 0.0 }
 0x12e   :  { %1647 = vrot.lane.b32.xlu0 %v963_v60, %s3979_s0  ;;  %v4362_v4 = vmax.f32 %v963_v60, 0.0  ;;  %v977_v19 = vadd.f32 %v4261_v42, %v957_v62  ;;  %v992_v14 = vmax.f32 %v976_v3, 0.0 }
 0x12f   :  { %1673 = vrot.lane.b32.xlu1 %v976_v3, %s3979_s0  ;;  %v991_v18 = vmax.f32 %v975_v9, 0.0 }
 0x130   :  { %3684 = vmatprep.mubr.msk.f32.mxu1 %vm999_vm1, %v4362_v4  ;;  %3710 = vmatprep.mubr.msk.f32.mxu0 %vm999_vm1, %v4362_v4 }
 0x131   :  { %3685 = vmatmul.mubr.msk.f32.vlgmr.msra.gmra.mrb[16].mxu1 %vm999_vm1, %v4364_v5  ;;  %3711 = vmatmul.mubr.msk.f32.vlgmr.msra.gmra.mrb[32].mxu0 %vm999_vm1, %v4364_v5 }
 0x132   :  { %1649 = vrot.lane.b32.xlu0 %v964_v17, %s3979_s0  ;;  %3687 = vmatprep.mubr.msk.f32.mxu1 %vm999_vm1, %v4368_v11 }
 0x133   :  { %3713 = vmatprep.mubr.msk.f32.mxu0 %vm999_vm1, %v4368_v11  ;;  %3735 = vmatpush3.msra.mxu1 %v4112_v21  ;;  %v971_v21 = vadd.f32 %v4261_v42, %v4309_v22  ;;  %v993_v22 = vmax.f32 %v977_v19, 0.0  ;;  %v994_v42 = vmax.f32 %v978_v16, 0.0 }
 0x134   :  { %1677 = vrot.lane.b32.xlu1 %v978_v16, %s3979_s0  ;;  %3761 = vmatpush3.msra.mxu0 %v1743_v25 }
 0x135   :  { %3688 = vmatmul.mubr.msk.f32.gmra.mrb[18].mxu1 %vm999_vm1, %v982_v20  ;;  %3714 = vmatmul.mubr.msk.f32.gmra.mrb[34].mxu0 %vm999_vm1, %v982_v20  ;;  %v987_v7 = vmax.f32 %v971_v21, 0.0 }
 0x136   :  { %1655 = vrot.lane.b32.xlu0 %v967_v15, %s3979_s0  ;;  %3690 = vmatprep.mubr.msk.f32.mxu1 %vm999_vm1, %v983_v53 }
 0x137   :  { %3716 = vmatprep.mubr.msk.f32.mxu0 %vm999_vm1, %v983_v53  ;;  %3786 = vmatprep.subr.mxu1 %v1745_v26 }
 0x138   :  { %3812 = vmatprep.subr.mxu0 %v4450_v34 }
 0x139   :  { %3691 = vmatmul.mubr.msk.f32.gmra.mrb[20].mxu1 %vm999_vm1, %v984_v63  ;;  %3717 = vmatmul.mubr.msk.f32.gmra.mrb[36].mxu0 %vm999_vm1, %v984_v63 }
 0x13a   :  { %1659 = vrot.lane.b32.xlu0 %v969_v57, %s3979_s0  ;;  %3693 = vmatprep.mubr.msk.f32.mxu1 %vm999_vm1, %v985_v1 }
 0x13b   :  { %3719 = vmatprep.mubr.msk.f32.mxu0 %vm999_vm1, %v985_v1 }
 0x13d   :  { %3694 = vmatmul.mubr.msk.f32.gmra.mrb[22].mxu1 %vm999_vm1, %v986_v6  ;;  %3720 = vmatmul.mubr.msk.f32.gmra.mrb[38].mxu0 %vm999_vm1, %v986_v6 }
 0x13e   :  { %1663 = vrot.lane.b32.xlu0 %v971_v21, %s3979_s0  ;;  %3696 = vmatprep.mubr.msk.f32.mxu1 %vm999_vm1, %v987_v7 }
 0x13f   :  { %3722 = vmatprep.mubr.msk.f32.mxu0 %vm999_vm1, %v987_v7 }
 0x141   :  { %3697 = vmatmul.mubr.msk.f32.gmra.mrb[24].mxu1 %vm999_vm1, %v988_v10  ;;  %3723 = vmatmul.mubr.msk.f32.gmra.mrb[40].mxu0 %vm999_vm1, %v988_v10 }
 0x142   :  { %1667 = vrot.lane.b32.xlu0 %v973_v8, %s3979_s0  ;;  %3699 = vmatprep.mubr.msk.f32.mxu1 %vm999_vm1, %v989_v27 }
 0x143   :  { %3725 = vmatprep.mubr.msk.f32.mxu0 %vm999_vm1, %v989_v27 }
 0x145   :  { %3700 = vmatmul.mubr.msk.f32.gmra.mrb[26].mxu1 %vm999_vm1, %v990_v29  ;;  %3726 = vmatmul.mubr.msk.f32.gmra.mrb[42].mxu0 %vm999_vm1, %v990_v29 }
 0x146   :  { %1671 = vrot.lane.b32.xlu0 %v975_v9, %s3979_s0  ;;  %3702 = vmatprep.mubr.msk.f32.mxu1 %vm999_vm1, %v991_v18 }
 0x147   :  { %3728 = vmatprep.mubr.msk.f32.mxu0 %vm999_vm1, %v991_v18 }
 0x149   :  { %3703 = vmatmul.mubr.msk.f32.gmra.mrb[28].mxu1 %vm999_vm1, %v992_v14  ;;  %3729 = vmatmul.mubr.msk.f32.gmra.mrb[44].mxu0 %vm999_vm1, %v992_v14 }
 0x14a   :  { %1675 = vrot.lane.b32.xlu0 %v977_v19, %s3979_s0  ;;  %3705 = vmatprep.mubr.msk.f32.mxu1 %vm999_vm1, %v993_v22 }
 0x14b   :  { %3731 = vmatprep.mubr.msk.f32.mxu0 %vm999_vm1, %v993_v22 }
 0x14d   :  { %3706 = vmatmul.mubr.msk.f32.gmra.mrb[30].mxu1 %vm999_vm1, %v994_v42  ;;  %3732 = vmatmul.mubr.msk.f32.gmra.mrb[46].mxu0 %vm999_vm1, %v994_v42 }
 0x14e   :  { %3736 = vmatprep.mubr.msk.f32.mxu1 %vm999_vm1, %v4362_v4 }
 0x151   :  { %3737 = vmatmul.mubr.msk.f32.vlgmr.msra.gmra.mrb[32].mxu1 %vm999_vm1, %v4364_v5 }
 0x152   :  { %3739 = vmatprep.mubr.msk.f32.mxu1 %vm999_vm1, %v4368_v11  ;;  %3787 = vmatpush3.msra.mxu1 %v1745_v26 }
 0x155   :  { %3740 = vmatmul.mubr.msk.f32.gmra.mrb[34].mxu1 %vm999_vm1, %v982_v20 }
 0x156   :  { %3742 = vmatprep.mubr.msk.f32.mxu1 %vm999_vm1, %v983_v53 }
 0x159   :  { %3743 = vmatmul.mubr.msk.f32.gmra.mrb[36].mxu1 %vm999_vm1, %v984_v63 }
 0x15a   :  { %3745 = vmatprep.mubr.msk.f32.mxu1 %vm999_vm1, %v985_v1 }
 0x15d   :  { %3746 = vmatmul.mubr.msk.f32.gmra.mrb[38].mxu1 %vm999_vm1, %v986_v6 }
 0x15e   :  { %3748 = vmatprep.mubr.msk.f32.mxu1 %vm999_vm1, %v987_v7 }
 0x161   :  { %3749 = vmatmul.mubr.msk.f32.gmra.mrb[40].mxu1 %vm999_vm1, %v988_v10 }
 0x162   :  { %3751 = vmatprep.mubr.msk.f32.mxu1 %vm999_vm1, %v989_v27 }
 0x165   :  { %3752 = vmatmul.mubr.msk.f32.gmra.mrb[42].mxu1 %vm999_vm1, %v990_v29 }
 0x166   :  { %3754 = vmatprep.mubr.msk.f32.mxu1 %vm999_vm1, %v991_v18 }
 0x169   :  { %3755 = vmatmul.mubr.msk.f32.gmra.mrb[44].mxu1 %vm999_vm1, %v992_v14 }
 0x16a   :  { %3757 = vmatprep.mubr.msk.f32.mxu1 %vm999_vm1, %v993_v22 }
 0x16d   :  { %3758 = vmatmul.mubr.msk.f32.gmra.mrb[46].mxu1 %vm999_vm1, %v994_v42 }
 0x204   :  { %v3686_v28 = vpop.f32.mrb[16].mxu1  ;;  %v3712_v24 = vpop.f32.mrb[32].mxu0 }
 0x205   :  { %v1194_v33 = vrot.slane %v3686_v28, 6  ;;  %v4453_v35 = vpop.f32.mrb[17].mxu1  ;;  %v4455_v37 = vpop.f32.mrb[33].mxu0 }
 0x206   :  { %v1193_v31 = vrot.slane %v4453_v35, 6 }
 0x208   :  { %v1223_v39 = vsel %vm501_vm2, %v1193_v31, %v1194_v33  ;;  %v3689_v36 = vpop.f32.mrb[18].mxu1  ;;  %v3715_v40 = vpop.f32.mrb[34].mxu0 }
 0x209   :  { %v4462_v41 = vadd.f32 %v3712_v24, %v1223_v39  ;;  %v1196_v44 = vrot.slane %v3689_v36, 6  ;;  %v1124_v43 = vpop.f32.mrb[19].mxu1  ;;  %v1317_v45 = vpop.f32.mrb[35].mxu0 }
 0x20a   :  { %v1195_v48 = vrot.slane %v1124_v43, 6 }
 0x20c   :  { %v1221_v47 = vsel %vm501_vm2, %v1195_v48, %v1196_v44  ;;  %v1222_v49 = vsel %vm501_vm2, %v1194_v33, %v1195_v48  ;;  %v3692_v54 = vpop.f32.mrb[20].mxu1  ;;  %v3718_v55 = vpop.f32.mrb[36].mxu0 }
 0x20d   :  { %v4468_v56 = vadd.f32 %v3715_v40, %v1221_v47  ;;  %v1227_v51 = vsel %vm253_vm3, 0.0, %v1222_v49  ;;  %v1198_v59 = vrot.slane %v3692_v54, 6  ;;  %v1134_v58 = vpop.f32.mrb[21].mxu1  ;;  %v1327_v61 = vpop.f32.mrb[37].mxu0 }
 0x20e   :  { %v4472_v0 = vadd.f32 %v1317_v45, %v1227_v51  ;;  %v1197_v13 = vrot.slane %v1134_v58, 6 }
 0x210   :  { %v1219_v17 = vsel %vm501_vm2, %v1197_v13, %v1198_v59  ;;  %v1220_v62 = vsel %vm501_vm2, %v1196_v44, %v1197_v13  ;;  %v3695_v60 = vpop.f32.mrb[22].mxu1  ;;  %v3721_v3 = vpop.f32.mrb[38].mxu0 }
 0x211   :  { %v4478_v4 = vadd.f32 %v3718_v55, %v1219_v17  ;;  %v1229_v5 = vsel %vm255_vm4, 0.0, %v1220_v62  ;;  %v1200_v11 = vrot.slane %v3695_v60, 6  ;;  %v1144_v15 = vpop.f32.mrb[23].mxu1  ;;  %v1337_v16 = vpop.f32.mrb[39].mxu0 }
 0x212   :  { %v4482_v20 = vadd.f32 %v1327_v61, %v1229_v5  ;;  %v1199_v53 = vrot.slane %v1144_v15, 6 }
 0x214   :  { %v1217_v57 = vsel %vm501_vm2, %v1199_v53, %v1200_v11  ;;  %v1218_v63 = vsel %vm501_vm2, %v1198_v59, %v1199_v53  ;;  %v3698_v1 = vpop.f32.mrb[24].mxu1  ;;  %v3724_v21 = vpop.f32.mrb[40].mxu0 }
 0x215   :  { %v4488_v6 = vadd.f32 %v3721_v3, %v1217_v57  ;;  %v1231_v7 = vsel %vm257_vm5, 0.0, %v1218_v63  ;;  %v1202_v8 = vrot.slane %v3698_v1, 6  ;;  %v1154_v10 = vpop.f32.mrb[25].mxu1  ;;  %v1347_v27 = vpop.f32.mrb[41].mxu0 }
 0x216   :  { %v4492_v9 = vadd.f32 %v1337_v16, %v1231_v7  ;;  %v1201_v29 = vrot.slane %v1154_v10, 6 }
 0x218   :  { %v1215_v18 = vsel %vm501_vm2, %v1201_v29, %v1202_v8  ;;  %v1216_v19 = vsel %vm501_vm2, %v1200_v11, %v1201_v29  ;;  %v3701_v14 = vpop.f32.mrb[26].mxu1  ;;  %v3727_v22 = vpop.f32.mrb[42].mxu0 }
 0x219   :  { %v4498_v42 = vadd.f32 %v3724_v21, %v1215_v18  ;;  %v1233_v25 = vsel %vm259_vm6, 0.0, %v1216_v19  ;;  %v1204_v26 = vrot.slane %v3701_v14, 6  ;;  %v1164_v28 = vpop.f32.mrb[27].mxu1  ;;  %v1357_v24 = vpop.f32.mrb[43].mxu0 }
 0x21a   :  { %v4502_v33 = vadd.f32 %v1347_v27, %v1233_v25  ;;  %v1203_v39 = vrot.slane %v1164_v28, 6 }
 0x21c   :  { %v1213_v36 = vsel %vm501_vm2, %v1203_v39, %v1204_v26  ;;  %v1214_v40 = vsel %vm501_vm2, %v1202_v8, %v1203_v39  ;;  %v3704_v44 = vpop.f32.mrb[28].mxu1  ;;  %v3730_v43 = vpop.f32.mrb[44].mxu0 }
 0x21d   :  { %v4508_v45 = vadd.f32 %v3727_v22, %v1213_v36  ;;  %v1235_v48 = vsel %vm261_vm7, 0.0, %v1214_v40  ;;  %v1206_v47 = vrot.slane %v3704_v44, 6  ;;  %v1174_v49 = vpop.f32.mrb[29].mxu1  ;;  %v1367_v54 = vpop.f32.mrb[45].mxu0 }
 0x21e   :  { %v4512_v55 = vadd.f32 %v1357_v24, %v1235_v48  ;;  %v1205_v51 = vrot.slane %v1174_v49, 6 }
 0x220   :  { %v1211_v59 = vsel %vm501_vm2, %v1205_v51, %v1206_v47  ;;  %v1212_v58 = vsel %vm501_vm2, %v1204_v26, %v1205_v51  ;;  %v3707_v61 = vpop.f32.mrb[30].mxu1  ;;  %v3733_v13 = vpop.f32.mrb[46].mxu0 }
 0x221   :  { %v4518_v17 = vadd.f32 %v3730_v43, %v1211_v59  ;;  %v1237_v62 = vsel %vm263_vm8, 0.0, %v1212_v58  ;;  %v1208_v60 = vrot.slane %v3707_v61, 6  ;;  %v1184_v3 = vpop.f32.mrb[31].mxu1  ;;  %v1377_v5 = vpop.f32.mrb[47].mxu0 }
 0x222   :  { %v4522_v11 = vadd.f32 %v1367_v54, %v1237_v62  ;;  %v1207_v15 = vrot.slane %v1184_v3, 6 }
 0x223   :  { %v1224_v16 = vsel %vm501_vm2, %v1208_v60, %v1193_v31 }
 0x224   :  { %v1225_v53 = vsel %vm251_vm9, 0.0, %v1224_v16  ;;  %v1209_v57 = vsel %vm501_vm2, %v1207_v15, %v1208_v60  ;;  %v1210_v63 = vsel %vm501_vm2, %v1206_v47, %v1207_v15  ;;  %v3738_v1 = vpop.f32.mrb[32].mxu1  ;;  %v1648_v15 = vpop.permute.xlu0 %1647 }
 0x225   :  { %v4535_v21 = vadd.f32 %v4455_v37, %v1225_v53  ;;  %v4537_v7 = vadd.f32 %v3733_v13, %v1209_v57  ;;  %v1239_v35 = vsel %vm265_vm10, 0.0, %v1210_v63  ;;  %v1532_v8 = vrot.slane %v3738_v1, 7  ;;  %v4541_v31 = vpop.f32.mrb[33].mxu1 }
 0x226   :  { %v4543_v10 = vadd.f32 %v1377_v5, %v1239_v35  ;;  %v1531_v27 = vrot.slane %v4541_v31, 7 }
 0x228   :  { %v1561_v29 = vsel %vm878_vm11, %v1531_v27, %v1532_v8  ;;  %v3741_v18 = vpop.f32.mrb[34].mxu1 }
 0x229   :  { %v1580_v37 = vadd.f32 %v1561_v29, %v4462_v41  ;;  %v1534_v19 = vrot.slane %v3741_v18, 7  ;;  %v1462_v14 = vpop.f32.mrb[35].mxu1  ;;  %v1652_v29 = vpop.permute.xlu1 %1651 }
 0x22a   :  { %v1533_v22 = vrot.slane %v1462_v14, 7 }
 0x22c   :  { %v1559_v25 = vsel %vm878_vm11, %v1533_v22, %v1534_v19  ;;  %v1560_v26 = vsel %vm878_vm11, %v1532_v8, %v1533_v22  ;;  %v3744_v28 = vpop.f32.mrb[36].mxu1 }
 0x22d   :  { %v1565_v24 = vsel %vm269_vm12, 0.0, %v1560_v26  ;;  %v4558_v39 = vadd.f32 %v1559_v25, %v4468_v56  ;;  %v1536_v36 = vrot.slane %v3744_v28, 7  ;;  %v1472_v40 = vpop.f32.mrb[37].mxu1  ;;  %vm5103_vm12 = vcmp.lt.s32.totalorder %v4163_v2, 1  ;;  %v1650_v28 = vpop.permute.xlu0 %1649 }
 0x22e   :  { %v1581_v41 = vadd.f32 %v1565_v24, %v4472_v0  ;;  %v1535_v44 = vrot.slane %v1472_v40, 7 }
 0x230   :  { %v1557_v43 = vsel %vm878_vm11, %v1535_v44, %v1536_v36  ;;  %v1558_v48 = vsel %vm878_vm11, %v1534_v19, %v1535_v44  ;;  %v3747_v47 = vpop.f32.mrb[38].mxu1 }
 0x231   :  { %v1567_v49 = vsel %vm271_vm13, 0.0, %v1558_v48  ;;  %v4568_v54 = vadd.f32 %v1557_v43, %v4478_v4  ;;  %v1482_v56 = vpop.f32.mrb[39].mxu1  ;;  %v1538_v59 = vrot.slane %v3747_v47, 7  ;;  %vm5104_vm13 = vcmp.lt.s32.totalorder %v4173_v12, 1  ;;  %v1654_v48 = vpop.permute.xlu1 %1653 }
 0x232   :  { %v1583_v51 = vadd.f32 %v1567_v49, %v4482_v20  ;;  %v1537_v58 = vrot.slane %v1482_v56, 7 }
 0x234   :  { %v1555_v0 = vsel %vm878_vm11, %v1537_v58, %v1538_v59  ;;  %v1556_v61 = vsel %vm878_vm11, %v1536_v36, %v1537_v58  ;;  %v3750_v13 = vpop.f32.mrb[40].mxu1  ;;  %v4603_v36 = vld [vmem:[#allocation3 + $0x38] ss:$0 sm:$0xff] }
 0x235   :  { %v1569_v62 = vsel %vm273_vm14, 0.0, %v1556_v61  ;;  %v4578_v60 = vadd.f32 %v1555_v0, %v4488_v6  ;;  %v1540_v4 = vrot.slane %v3750_v13, 7  ;;  %v1492_v3 = vpop.f32.mrb[41].mxu1  ;;  %vm5105_vm14 = vcmp.lt.s32.totalorder %v4190_v32, 1  ;;  %v1656_v13 = vpop.permute.xlu0 %1655 }
 0x236   :  { %v1585_v5 = vadd.f32 %v1569_v62, %v4492_v9  ;;  %v1539_v20 = vrot.slane %v1492_v3, 7  ;;  %v1600_v56 = vadd.f32 %v4603_v36, %v1580_v37  ;;  %v1601_v0 = vadd.f32 %v4603_v36, %v1581_v41 }
 0x238   :  { %v1553_v16 = vsel %vm878_vm11, %v1539_v20, %v1540_v4  ;;  %v1554_v53 = vsel %vm878_vm11, %v1538_v59, %v1539_v20  ;;  %v3753_v57 = vpop.f32.mrb[42].mxu1  ;;  %v1658_v20 = vpop.permute.xlu1 %1657 }
 0x239   :  { %v1571_v63 = vsel %vm5103_vm12, 0.0, %v1554_v53  ;;  %v4588_v1 = vadd.f32 %v1553_v16, %v4498_v42  ;;  %v1542_v6 = vrot.slane %v3753_v57, 7  ;;  %v1502_v35 = vpop.f32.mrb[43].mxu1  ;;  %v1617_v16 = vmax.f32 %v1601_v0, 0.0 }
 0x23a   :  { %v1587_v8 = vadd.f32 %v1571_v63, %v4502_v33  ;;  %v1541_v9 = vrot.slane %v1502_v35, 7  ;;  %v1603_v53 = vadd.f32 %v4603_v36, %v1583_v51  ;;  %v1660_v63 = vpop.permute.xlu0 %1659  ;;  %vm1733_vm12 = vcmp.lt.s32.totalorder %v4148_v52, 4 }
 0x23c   :  { %v1551_v18 = vsel %vm878_vm11, %v1541_v9, %v1542_v6  ;;  %v1552_v19 = vsel %vm878_vm11, %v1540_v4, %v1541_v9  ;;  %v3756_v14 = vpop.f32.mrb[44].mxu1  ;;  %v1616_v4 = vmax.f32 %v1600_v56, 0.0  ;;  %v1619_v9 = vmax.f32 %v1603_v53, 0.0 }
 0x23d   :  { %v1573_v22 = vsel %vm5104_vm13, 0.0, %v1552_v19  ;;  %v4598_v25 = vadd.f32 %v1551_v18, %v4508_v45  ;;  %v1544_v42 = vrot.slane %v3756_v14, 7  ;;  %v1512_v26 = vpop.f32.mrb[45].mxu1  ;;  %v1605_v18 = vadd.f32 %v4603_v36, %v1585_v5 }
 0x23e   :  { %v4601_v33 = vadd.f32 %v1573_v22, %v4512_v55  ;;  %v1543_v24 = vrot.slane %v1512_v26, 7  ;;  %v1697_v19 = vadd.f32 %v1652_v29, %v1617_v16  ;;  %v1699_v5 = vadd.f32 %v1656_v13, %v1619_v9 }
 0x23f   :  { %vm1735_vm13 = vcmp.lt.s32.totalorder %v4163_v2, 4 }
 0x240   :  { %v1549_v40 = vsel %vm878_vm11, %v1543_v24, %v1544_v42  ;;  %v1550_v44 = vsel %vm878_vm11, %v1542_v6, %v1543_v24  ;;  %v3759_v43 = vpop.f32.mrb[46].mxu1  ;;  %v1696_v6 = vadd.f32 %v1650_v28, %v1616_v4  ;;  %v1621_v28 = vmax.f32 %v1605_v18, 0.0 }
 0x241   :  { %v1575_v45 = vsel %vm5105_vm14, 0.0, %v1550_v44  ;;  %v4612_v47 = vadd.f32 %v1549_v40, %v4518_v17  ;;  %v1546_v49 = vrot.slane %v3759_v43, 7  ;;  %v1522_v55 = vpop.f32.mrb[47].mxu1  ;;  %v1607_v24 = vadd.f32 %v4603_v36, %v1587_v8 }
 0x242   :  { %v4616_v59 = vadd.f32 %v1575_v45, %v4522_v11  ;;  %v1545_v58 = vrot.slane %v1522_v55, 7  ;;  %v4647_v22 = vmax.f32 %v1696_v6, 0.0  ;;  %v1608_v8 = vadd.f32 %v4603_v36, %v4588_v1 }
 0x243   :  { %v1562_v61 = vsel %vm878_vm11, %v1546_v49, %v1531_v27  ;;  %v1602_v27 = vadd.f32 %v4603_v36, %v4558_v39  ;;  %v1623_v43 = vmax.f32 %v1607_v24, 0.0  ;;  %v4673_v45 = vmax.f32 %v1699_v5, 0.0 }
 0x244   :  { %v1563_v17 = vsel %vm267_vm0, 0.0, %v1562_v61  ;;  %v1547_v62 = vsel %vm878_vm11, %v1545_v58, %v1546_v49  ;;  %v1548_v37 = vsel %vm878_vm11, %v1544_v42, %v1545_v58  ;;  %v1606_v42 = vadd.f32 %v4603_v36, %v4578_v60 }
 0x245   :  { %v1579_v11 = vadd.f32 %v1563_v17, %v4535_v21  ;;  %v1577_v41 = vsel %vm281_vm15, 0.0, %v1548_v37  ;;  %v4633_v31 = vadd.f32 %v1547_v62, %v4537_v7  ;;  %v1618_v35 = vmax.f32 %v1602_v27, 0.0 }
 0x246   :  { %v4638_v3 = vadd.f32 %v1577_v41, %v4543_v10  ;;  %v1604_v7 = vadd.f32 %v4603_v36, %v4568_v54  ;;  %v1662_v10 = vpop.permute.xlu1 %1661  ;;  %v4656_v54 = vmax.f32 %v1697_v19, 0.0  ;;  %v1622_v60 = vmax.f32 %v1606_v42, 0.0 }
 0x247   :  { %v1599_v57 = vadd.f32 %v4603_v36, %v1579_v11  ;;  %v1698_v26 = vadd.f32 %v1654_v48, %v1618_v35  ;;  %v1609_v48 = vadd.f32 %v4603_v36, %v4601_v33  ;;  %v1701_v49 = vadd.f32 %v1660_v63, %v1621_v28  ;;  %v4766_v28 = vld [vmem:[#allocation3 + $0x68] sm:$0xff] }
 0x248   :  { %v1620_v51 = vmax.f32 %v1604_v7, 0.0  ;;  %v1624_v1 = vmax.f32 %v1608_v8, 0.0  ;;  %v1610_v33 = vadd.f32 %v4603_v36, %v4598_v25  ;;  %v1702_v56 = vadd.f32 %v1662_v10, %v1622_v60 }
 0x249   :  { %v1615_v21 = vmax.f32 %v1599_v57, 0.0  ;;  %v4669_v29 = vmax.f32 %v1698_v26, 0.0  ;;  %v1625_v58 = vmax.f32 %v1609_v48, 0.0  ;;  %v1611_v0 = vadd.f32 %v4603_v36, %v4616_v59  ;;  %v2413_v26 = vld [vmem:[#allocation3 + $0x70] sm:$0xff] }
 0x24a   :  { %v1700_v40 = vadd.f32 %v1658_v20, %v1620_v51  ;;  %v1666_v44 = vpop.permute.xlu1 %1665  ;;  %v1717_v61 = vmax.f32 %v1701_v49, 0.0  ;;  %v1626_v25 = vmax.f32 %v1610_v33, 0.0  ;;  %v1612_v62 = vadd.f32 %v4603_v36, %v4612_v47 }
 0x24b   :  { %v1695_v39 = vadd.f32 %v1648_v15, %v1615_v21  ;;  %v1664_v15 = vpop.permute.xlu0 %1663  ;;  %v4697_v37 = vmax.f32 %v1702_v56, 0.0  ;;  %v1704_v59 = vadd.f32 %v1666_v44, %v1624_v1  ;;  %v1627_v11 = vmax.f32 %v1611_v0, 0.0 }
 0x24c   :  { %v4685_v55 = vmax.f32 %v1700_v40, 0.0  ;;  %v1703_v13 = vadd.f32 %v1664_v15, %v1623_v43  ;;  %v1613_v41 = vadd.f32 %v4603_v36, %v4638_v3  ;;  %v1628_v47 = vmax.f32 %v1612_v62, 0.0 }
 0x24d   :  { %v4645_v14 = vmax.f32 %v1695_v39, 0.0  ;;  %v1614_v16 = vadd.f32 %v4603_v36, %v4633_v31  ;;  %v4709_v53 = vmax.f32 %v1704_v59, 0.0  ;;  %vm1956_vm11 = vcmp.lt.s32.totalorder %v4115_v23, 4 }
 0x24e   :  { %v1670_v17 = vpop.permute.xlu1 %1669  ;;  %v1719_v4 = vmax.f32 %v1703_v13, 0.0  ;;  %v1629_v21 = vmax.f32 %v1613_v41, 0.0  ;;  %vm1729_vm15 = vcmp.lt.s32.totalorder %v4123_v30, 4  ;;  %vm1731_vm0 = vcmp.lt.s32.totalorder %v4133_v38, 4 }
 0x24f   :  { %3762 = vmatprep.mubr.msk.f32.mxu0 %vm999_vm1, %v4645_v14  ;;  %3788 = vmatprep.mubr.msk.f32.mxu1 %vm999_vm1, %v4645_v14  ;;  %v1706_v3 = vadd.f32 %v1670_v17, %v1626_v25  ;;  %v1630_v7 = vmax.f32 %v1614_v16, 0.0  ;;  %vm1737_vm14 = vcmp.lt.s32.totalorder %v4173_v12, 4 }
 0x250   :  { %3763 = vmatmul.mubr.msk.f32.vlgmr.msra.gmra.mrb[48].mxu0 %vm999_vm1, %v4647_v22  ;;  %3789 = vmatmul.mubr.msk.f32.vlgmr.msra.gmra.mrb[48].mxu1 %vm999_vm1, %v4647_v22 }
 0x251   :  { %3765 = vmatprep.mubr.msk.f32.mxu0 %vm999_vm1, %v4656_v54  ;;  %3791 = vmatprep.mubr.msk.f32.mxu1 %vm999_vm1, %v4656_v54  ;;  %v4717_v36 = vmax.f32 %v1706_v3, 0.0 }
 0x252   :  { %3813 = vmatpush3.msra.mxu0 %v4450_v34  ;;  %v1668_v34 = vpop.permute.xlu0 %1667  ;;  %v1674_v57 = vpop.permute.xlu1 %1673 }
 0x253   :  { %v1705_v27 = vadd.f32 %v1668_v34, %v1625_v58  ;;  %v1708_v31 = vadd.f32 %v1674_v57, %v1628_v47  ;;  %3864 = vmatprep.subr.mxu0 %v2413_v26 }
 0x254   :  { %3766 = vmatmul.mubr.msk.f32.gmra.mrb[50].mxu0 %vm999_vm1, %v4669_v29  ;;  %3792 = vmatmul.mubr.msk.f32.gmra.mrb[50].mxu1 %vm999_vm1, %v4669_v29 }
 0x255   :  { %3768 = vmatprep.mubr.msk.f32.mxu0 %vm999_vm1, %v4673_v45  ;;  %3794 = vmatprep.mubr.msk.f32.mxu1 %vm999_vm1, %v4673_v45  ;;  %v1721_v63 = vmax.f32 %v1705_v27, 0.0  ;;  %v4725_v19 = vmax.f32 %v1708_v31, 0.0 }
 0x256   :  { %v1672_v20 = vpop.permute.xlu0 %1671  ;;  %v1678_v39 = vpop.permute.xlu1 %1677 }
 0x257   :  { %v1707_v6 = vadd.f32 %v1672_v20, %v1627_v11  ;;  %v1710_v10 = vadd.f32 %v1678_v39, %v1630_v7 }
 0x258   :  { %3769 = vmatmul.mubr.msk.f32.gmra.mrb[52].mxu0 %vm999_vm1, %v4685_v55  ;;  %3795 = vmatmul.mubr.msk.f32.gmra.mrb[52].mxu1 %vm999_vm1, %v4685_v55 }
 0x259   :  { %3771 = vmatprep.mubr.msk.f32.mxu0 %vm999_vm1, %v1717_v61  ;;  %3797 = vmatprep.mubr.msk.f32.mxu1 %vm999_vm1, %v1717_v61  ;;  %v1723_v9 = vmax.f32 %v1707_v6, 0.0  ;;  %v4733_v42 = vmax.f32 %v1710_v10, 0.0 }
 0x25a   :  { %v1676_v35 = vpop.permute.xlu0 %1675 }
 0x25b   :  { %v1709_v18 = vadd.f32 %v1676_v35, %v1629_v21 }
 0x25c   :  { %3772 = vmatmul.mubr.msk.f32.gmra.mrb[54].mxu0 %vm999_vm1, %v4697_v37  ;;  %3798 = vmatmul.mubr.msk.f32.gmra.mrb[54].mxu1 %vm999_vm1, %v4697_v37 }
 0x25d   :  { %3774 = vmatprep.mubr.msk.f32.mxu0 %vm999_vm1, %v1719_v4  ;;  %3800 = vmatprep.mubr.msk.f32.mxu1 %vm999_vm1, %v1719_v4  ;;  %v1725_v51 = vmax.f32 %v1709_v18, 0.0 }
 0x260   :  { %3775 = vmatmul.mubr.msk.f32.gmra.mrb[56].mxu0 %vm999_vm1, %v4709_v53  ;;  %3801 = vmatmul.mubr.msk.f32.gmra.mrb[56].mxu1 %vm999_vm1, %v4709_v53 }
 0x261   :  { %3777 = vmatprep.mubr.msk.f32.mxu0 %vm999_vm1, %v1721_v63  ;;  %3803 = vmatprep.mubr.msk.f32.mxu1 %vm999_vm1, %v1721_v63 }
 0x264   :  { %3778 = vmatmul.mubr.msk.f32.gmra.mrb[58].mxu0 %vm999_vm1, %v4717_v36  ;;  %3804 = vmatmul.mubr.msk.f32.gmra.mrb[58].mxu1 %vm999_vm1, %v4717_v36 }
 0x265   :  { %3780 = vmatprep.mubr.msk.f32.mxu0 %vm999_vm1, %v1723_v9  ;;  %3806 = vmatprep.mubr.msk.f32.mxu1 %vm999_vm1, %v1723_v9 }
 0x268   :  { %3781 = vmatmul.mubr.msk.f32.gmra.mrb[60].mxu0 %vm999_vm1, %v4725_v19  ;;  %3807 = vmatmul.mubr.msk.f32.gmra.mrb[60].mxu1 %vm999_vm1, %v4725_v19 }
 0x269   :  { %3783 = vmatprep.mubr.msk.f32.mxu0 %vm999_vm1, %v1725_v51  ;;  %3809 = vmatprep.mubr.msk.f32.mxu1 %vm999_vm1, %v1725_v51 }
 0x26c   :  { %3784 = vmatmul.mubr.msk.f32.gmra.mrb[62].mxu0 %vm999_vm1, %v4733_v42  ;;  %3810 = vmatmul.mubr.msk.f32.gmra.mrb[62].mxu1 %vm999_vm1, %v4733_v42 }
 0x26d   :  { %3814 = vmatprep.mubr.msk.f32.mxu0 %vm999_vm1, %v4645_v14  ;;  %v2411_v14 = vld [vmem:[#allocation3 + $0x60] sm:$0xff] }
 0x26e   :  { %3838 = vmatprep.subr.mxu1 %v2411_v14 }
 0x26f   :  { %3839 = vmatpush3.msra.mxu1 %v2411_v14 }
 0x270   :  { %3815 = vmatmul.mubr.msk.f32.vlgmr.msra.gmra.mrb[64].mxu0 %vm999_vm1, %v4647_v22  ;;  %3890 = vmatprep.subr.mxu1 %v4766_v28 }
 0x271   :  { %3817 = vmatprep.mubr.msk.f32.mxu0 %vm999_vm1, %v4656_v54  ;;  %3865 = vmatpush3.msra.mxu0 %v2413_v26 }
 0x274   :  { %3818 = vmatmul.mubr.msk.f32.gmra.mrb[66].mxu0 %vm999_vm1, %v4669_v29 }
 0x275   :  { %3820 = vmatprep.mubr.msk.f32.mxu0 %vm999_vm1, %v4673_v45 }
 0x278   :  { %3821 = vmatmul.mubr.msk.f32.gmra.mrb[68].mxu0 %vm999_vm1, %v4685_v55 }
 0x279   :  { %3823 = vmatprep.mubr.msk.f32.mxu0 %vm999_vm1, %v1717_v61 }
 0x27c   :  { %3824 = vmatmul.mubr.msk.f32.gmra.mrb[70].mxu0 %vm999_vm1, %v4697_v37 }
 0x27d   :  { %3826 = vmatprep.mubr.msk.f32.mxu0 %vm999_vm1, %v1719_v4 }
 0x280   :  { %3827 = vmatmul.mubr.msk.f32.gmra.mrb[72].mxu0 %vm999_vm1, %v4709_v53 }
 0x281   :  { %3829 = vmatprep.mubr.msk.f32.mxu0 %vm999_vm1, %v1721_v63 }
 0x284   :  { %3830 = vmatmul.mubr.msk.f32.gmra.mrb[74].mxu0 %vm999_vm1, %v4717_v36 }
 0x285   :  { %3832 = vmatprep.mubr.msk.f32.mxu0 %vm999_vm1, %v1723_v9 }
 0x288   :  { %3833 = vmatmul.mubr.msk.f32.gmra.mrb[76].mxu0 %vm999_vm1, %v4725_v19 }
 0x289   :  { %3835 = vmatprep.mubr.msk.f32.mxu0 %vm999_vm1, %v1725_v51 }
 0x28c   :  { %3836 = vmatmul.mubr.msk.f32.gmra.mrb[78].mxu0 %vm999_vm1, %v4733_v42 }
 0x323   :  { %v3764_v24 = vpop.f32.mrb[48].mxu0  ;;  %v3790_v54 = vpop.f32.mrb[48].mxu1 }
 0x324   :  { %v1941_v5 = vrot.slane %v3764_v24, 4  ;;  %v4770_v15 = vpop.f32.mrb[49].mxu0  ;;  %v4772_v60 = vpop.f32.mrb[49].mxu1 }
 0x325   :  { %v1940_v8 = vrot.slane %v4770_v15, 4 }
 0x327   :  { %v1971_v40 = vsel %vm1956_vm11, %v1940_v8, %v1941_v5  ;;  %v3767_v44 = vpop.f32.mrb[50].mxu0  ;;  %v3793_v43 = vpop.f32.mrb[50].mxu1 }
 0x328   :  { %v4779_v48 = vadd.f32 %v3790_v54, %v1971_v40  ;;  %v1943_v45 = vrot.slane %v3767_v44, 4  ;;  %v1871_v49 = vpop.f32.mrb[51].mxu0  ;;  %v2097_v34 = vpop.f32.mrb[51].mxu1 }
 0x329   :  { %v1942_v1 = vrot.slane %v1871_v49, 4 }
 0x32b   :  { %v1969_v33 = vsel %vm1956_vm11, %v1942_v1, %v1943_v45  ;;  %v1970_v56 = vsel %vm1956_vm11, %v1941_v5, %v1942_v1  ;;  %v3770_v58 = vpop.f32.mrb[52].mxu0  ;;  %v3796_v0 = vpop.f32.mrb[52].mxu1 }
 0x32c   :  { %v4786_v61 = vadd.f32 %v3793_v43, %v1969_v33  ;;  %v2007_v13 = vsel %vm1729_vm15, 0.0, %v1970_v56  ;;  %v1945_v17 = vrot.slane %v3770_v58, 4  ;;  %v1881_v25 = vpop.f32.mrb[53].mxu0  ;;  %v2107_v62 = vpop.f32.mrb[53].mxu1  ;;  %vm1739_vm15 = vcmp.lt.s32.totalorder %v4190_v32, 4 }
 0x32d   :  { %v4788_v59 = vadd.f32 %v2097_v34, %v2007_v13  ;;  %v1944_v11 = vrot.slane %v1881_v25, 4 }
 0x32f   :  { %v1967_v41 = vsel %vm1956_vm11, %v1944_v11, %v1945_v17  ;;  %v1968_v4 = vsel %vm1956_vm11, %v1943_v45, %v1944_v11  ;;  %v3773_v27 = vpop.f32.mrb[54].mxu0  ;;  %v3799_v20 = vpop.f32.mrb[54].mxu1 }
 0x330   :  { %v4795_v47 = vadd.f32 %v3796_v0, %v1967_v41  ;;  %v2009_v16 = vsel %vm1731_vm0, 0.0, %v1968_v4  ;;  %v1947_v3 = vrot.slane %v3773_v27, 4  ;;  %v1891_v57 = vpop.f32.mrb[55].mxu0  ;;  %v2117_v21 = vpop.f32.mrb[55].mxu1  ;;  %vm1727_vm0 = vcmp.lt.s32.totalorder %v4202_v46, 4 }
 0x331   :  { %v4797_v63 = vadd.f32 %v2107_v62, %v2009_v16  ;;  %v1946_v6 = vrot.slane %v1891_v57, 4 }
 0x333   :  { %v1965_v35 = vsel %vm1956_vm11, %v1946_v6, %v1947_v3  ;;  %v1966_v7 = vsel %vm1956_vm11, %v1945_v17, %v1946_v6  ;;  %v3776_v31 = vpop.f32.mrb[56].mxu0  ;;  %v3802_v9 = vpop.f32.mrb[56].mxu1 }
 0x334   :  { %v4804_v18 = vadd.f32 %v3799_v20, %v1965_v35  ;;  %v2011_v39 = vsel %vm1733_vm12, 0.0, %v1966_v7  ;;  %v1949_v10 = vrot.slane %v3776_v31, 4  ;;  %v1901_v51 = vpop.f32.mrb[57].mxu0  ;;  %v2127_v14 = vpop.f32.mrb[57].mxu1  ;;  %vm1741_vm12 = vcmp.lt.s32.totalorder %v4207_v50, 4 }
 0x335   :  { %v4806_v26 = vadd.f32 %v2117_v21, %v2011_v39  ;;  %v1948_v24 = vrot.slane %v1901_v51, 4 }
 0x337   :  { %v1963_v54 = vsel %vm1956_vm11, %v1948_v24, %v1949_v10  ;;  %v1964_v5 = vsel %vm1956_vm11, %v1947_v3, %v1948_v24  ;;  %v3779_v40 = vpop.f32.mrb[58].mxu0  ;;  %v3805_v44 = vpop.f32.mrb[58].mxu1 }
 0x338   :  { %v4813_v43 = vadd.f32 %v3802_v9, %v1963_v54  ;;  %v2013_v45 = vsel %vm1735_vm13, 0.0, %v1964_v5  ;;  %v1951_v49 = vrot.slane %v3779_v40, 4  ;;  %v1911_v34 = vpop.f32.mrb[59].mxu0  ;;  %v2137_v1 = vpop.f32.mrb[59].mxu1 }
 0x339   :  { %v4815_v33 = vadd.f32 %v2127_v14, %v2013_v45  ;;  %v1950_v56 = vrot.slane %v1911_v34, 4 }
 0x33b   :  { %v1961_v58 = vsel %vm1956_vm11, %v1950_v56, %v1951_v49  ;;  %v1962_v0 = vsel %vm1956_vm11, %v1949_v10, %v1950_v56  ;;  %v3782_v13 = vpop.f32.mrb[60].mxu0  ;;  %v3808_v17 = vpop.f32.mrb[60].mxu1 }
 0x33c   :  { %v4822_v25 = vadd.f32 %v3805_v44, %v1961_v58  ;;  %v2015_v62 = vsel %vm1737_vm14, 0.0, %v1962_v0  ;;  %v1953_v11 = vrot.slane %v3782_v13, 4  ;;  %v1921_v41 = vpop.f32.mrb[61].mxu0  ;;  %v2147_v4 = vpop.f32.mrb[61].mxu1 }
 0x33d   :  { %v4824_v27 = vadd.f32 %v2137_v1, %v2015_v62  ;;  %v1952_v20 = vrot.slane %v1921_v41, 4 }
 0x33f   :  { %v1959_v16 = vsel %vm1956_vm11, %v1952_v20, %v1953_v11  ;;  %v1960_v3 = vsel %vm1956_vm11, %v1951_v49, %v1952_v20  ;;  %v3785_v57 = vpop.f32.mrb[62].mxu0  ;;  %v3811_v21 = vpop.f32.mrb[62].mxu1 }
 0x340   :  { %v4831_v6 = vadd.f32 %v3808_v17, %v1959_v16  ;;  %v2017_v35 = vsel %vm1739_vm15, 0.0, %v1960_v3  ;;  %v1955_v7 = vrot.slane %v3785_v57, 4  ;;  %v1931_v31 = vpop.f32.mrb[63].mxu0  ;;  %v2157_v9 = vpop.f32.mrb[63].mxu1 }
 0x341   :  { %v4834_v39 = vadd.f32 %v2147_v4, %v2017_v35  ;;  %v1954_v10 = vrot.slane %v1931_v31, 4 }
 0x342   :  { %v1972_v51 = vsel %vm1956_vm11, %v1955_v7, %v1940_v8 }
 0x343   :  { %v2005_v14 = vsel %vm1727_vm0, 0.0, %v1972_v51  ;;  %v1957_v24 = vsel %vm1956_vm11, %v1954_v10, %v1955_v7  ;;  %v1958_v54 = vsel %vm1956_vm11, %v1953_v11, %v1954_v10  ;;  %v3816_v5 = vpop.f32.mrb[64].mxu0 }
 0x344   :  { %v4846_v40 = vadd.f32 %v4772_v60, %v2005_v14  ;;  %v4848_v44 = vadd.f32 %v3811_v21, %v1957_v24  ;;  %v2019_v45 = vsel %vm1741_vm12, 0.0, %v1958_v54  ;;  %v2312_v49 = vrot.slane %v3816_v5, 6  ;;  %v4850_v34 = vpop.f32.mrb[65].mxu0 }
 0x345   :  { %v4852_v15 = vadd.f32 %v2157_v9, %v2019_v45  ;;  %v2311_v8 = vrot.slane %v4850_v34, 6 }
 0x347   :  { %v2341_v1 = vsel %vm501_vm2, %v2311_v8, %v2312_v49  ;;  %v3819_v56 = vpop.f32.mrb[66].mxu0 }
 0x348   :  { %v4860_v58 = vadd.f32 %v2341_v1, %v4779_v48  ;;  %v2314_v60 = vrot.slane %v3819_v56, 6  ;;  %v2242_v0 = vpop.f32.mrb[67].mxu0 }
 0x349   :  { %v2313_v13 = vrot.slane %v2242_v0, 6 }
 0x34b   :  { %v2339_v17 = vsel %vm501_vm2, %v2313_v13, %v2314_v60  ;;  %v2340_v62 = vsel %vm501_vm2, %v2312_v49, %v2313_v13  ;;  %v3822_v11 = vpop.f32.mrb[68].mxu0 }
 0x34c   :  { %v2345_v41 = vsel %vm253_vm3, 0.0, %v2340_v62  ;;  %v4869_v4 = vadd.f32 %v2339_v17, %v4786_v61  ;;  %v2316_v20 = vrot.slane %v3822_v11, 6  ;;  %v2252_v16 = vpop.f32.mrb[69].mxu0  ;;  %vm3981_vm3 = vmmov 0  }
 0x34d   :  { %v2361_v48 = vadd.f32 %v2345_v41, %v4788_v59  ;;  %v2315_v3 = vrot.slane %v2252_v16, 6 }
 0x34f   :  { %v2337_v57 = vsel %vm501_vm2, %v2315_v3, %v2316_v20  ;;  %v2338_v21 = vsel %vm501_vm2, %v2314_v60, %v2315_v3  ;;  %v3825_v35 = vpop.f32.mrb[70].mxu0 }
 0x350   :  { %v2347_v7 = vsel %vm255_vm4, 0.0, %v2338_v21  ;;  %v4879_v30 = vadd.f32 %v2337_v57, %v4795_v47  ;;  %v2318_v61 = vrot.slane %v3825_v35, 6  ;;  %v2262_v31 = vpop.f32.mrb[71].mxu0 }
 0x351   :  { %v2363_v9 = vadd.f32 %v2347_v7, %v4797_v63  ;;  %v2317_v10 = vrot.slane %v2262_v31, 6  ;;  %v4920_v31 = vld [vmem:[#allocation3 + $0x58] ss:$0 sm:$0xff] }
 0x352   :  { %v2380_v34 = vadd.f32 %v4920_v31, %v4860_v58 }
 0x353   :  { %v2335_v59 = vsel %vm501_vm2, %v2317_v10, %v2318_v61  ;;  %v2336_v51 = vsel %vm501_vm2, %v2316_v20, %v2317_v10  ;;  %v3828_v14 = vpop.f32.mrb[72].mxu0 }
 0x354   :  { %v2349_v24 = vsel %vm257_vm5, 0.0, %v2336_v51  ;;  %v4889_v38 = vadd.f32 %v2335_v59, %v4804_v18  ;;  %v2320_v47 = vrot.slane %v3828_v14, 6  ;;  %v2272_v54 = vpop.f32.mrb[73].mxu0  ;;  %v2381_v14 = vadd.f32 %v4920_v31, %v2361_v48 }
 0x355   :  { %v2365_v5 = vadd.f32 %v2349_v24, %v4806_v26  ;;  %v2319_v45 = vrot.slane %v2272_v54, 6  ;;  %v2382_v54 = vadd.f32 %v4920_v31, %v4869_v4 }
 0x356   :  { %v2397_v50 = vmax.f32 %v2381_v14, 0.0 }
 0x357   :  { %v2333_v63 = vsel %vm501_vm2, %v2319_v45, %v2320_v47  ;;  %v2334_v49 = vsel %vm501_vm2, %v2318_v61, %v2319_v45  ;;  %v3831_v1 = vpop.f32.mrb[74].mxu0  ;;  %v2385_v4 = vadd.f32 %v4920_v31, %v2365_v5 }
 0x358   :  { %v2351_v56 = vsel %vm259_vm6, 0.0, %v2334_v49  ;;  %v4899_v52 = vadd.f32 %v2333_v63, %v4813_v43  ;;  %v2322_v18 = vrot.slane %v3831_v1, 6  ;;  %v2282_v60 = vpop.f32.mrb[75].mxu0 }
 0x359   :  { %v2367_v0 = vadd.f32 %v2351_v56, %v4815_v33  ;;  %v2321_v13 = vrot.slane %v2282_v60, 6 }
 0x35a   :  { %v2388_v5 = vadd.f32 %v4920_v31, %v4899_v52 }
 0x35b   :  { %v2331_v26 = vsel %vm501_vm2, %v2321_v13, %v2322_v18  ;;  %v2332_v17 = vsel %vm501_vm2, %v2320_v47, %v2321_v13  ;;  %v3834_v62 = vpop.f32.mrb[76].mxu0  ;;  %v2396_v47 = vmax.f32 %v2380_v34, 0.0  ;;  %v2387_v45 = vadd.f32 %v4920_v31, %v2367_v0 }
 0x35c   :  { %v2353_v11 = vsel %vm261_vm7, 0.0, %v2332_v17  ;;  %v4909_v2 = vadd.f32 %v2331_v26, %v4822_v25  ;;  %v2324_v43 = vrot.slane %v3834_v62, 6  ;;  %v2292_v41 = vpop.f32.mrb[77].mxu0 }
 0x35d   :  { %v2369_v20 = vadd.f32 %v2353_v11, %v4824_v27  ;;  %v2323_v16 = vrot.slane %v2292_v41, 6  ;;  %v2403_v63 = vmax.f32 %v2387_v45, 0.0 }
 0x35e   :  { %v2390_v1 = vadd.f32 %v4920_v31, %v4909_v2  ;;  %v3102_v2 = vld [vmem:[#allocation3 + $0x80] sm:$0xff] }
 0x35f   :  { %v2329_v33 = vsel %vm501_vm2, %v2323_v16, %v2324_v43  ;;  %v2330_v3 = vsel %vm501_vm2, %v2322_v18, %v2323_v16  ;;  %v3837_v57 = vpop.f32.mrb[78].mxu0  ;;  %v2389_v49 = vadd.f32 %v4920_v31, %v2369_v20 }
 0x360   :  { %v2355_v21 = vsel %vm263_vm8, 0.0, %v2330_v3  ;;  %v2372_v12 = vadd.f32 %v2329_v33, %v4831_v6  ;;  %v2326_v35 = vrot.slane %v3837_v57, 6  ;;  %v2302_v25 = vpop.f32.mrb[79].mxu0  ;;  %v2406_v52 = vmax.f32 %v2390_v1, 0.0 }
 0x361   :  { %v2371_v7 = vadd.f32 %v2355_v21, %v4834_v39  ;;  %v2325_v61 = vrot.slane %v2302_v25, 6  ;;  %v2405_v56 = vmax.f32 %v2389_v49, 0.0 }
 0x362   :  { %v2342_v27 = vsel %vm501_vm2, %v2326_v35, %v2311_v8  ;;  %v2392_v60 = vadd.f32 %v4920_v31, %v2372_v12 }
 0x363   :  { %v2343_v10 = vsel %vm251_vm9, 0.0, %v2342_v27  ;;  %v2327_v32 = vsel %vm501_vm2, %v2325_v61, %v2326_v35  ;;  %v2328_v6 = vsel %vm501_vm2, %v2324_v43, %v2325_v61  ;;  %v2391_v18 = vadd.f32 %v4920_v31, %v2371_v7 }
 0x364   :  { %v2359_v59 = vadd.f32 %v2343_v10, %v4846_v40  ;;  %v2357_v39 = vsel %vm265_vm10, 0.0, %v2328_v6  ;;  %v2374_v51 = vadd.f32 %v2327_v32, %v4848_v44  ;;  %v2383_v40 = vadd.f32 %v4920_v31, %v2363_v9 }
 0x365   :  { %v2373_v8 = vadd.f32 %v2357_v39, %v4852_v15  ;;  %v2398_v44 = vmax.f32 %v2382_v54, 0.0  ;;  %v2384_v15 = vadd.f32 %v4920_v31, %v4879_v30  ;;  %v2386_v9 = vadd.f32 %v4920_v31, %v4889_v38 }
 0x366   :  { %v2379_v46 = vadd.f32 %v4920_v31, %v2359_v59  ;;  %v2399_v58 = vmax.f32 %v2383_v40, 0.0  ;;  %v2404_v38 = vmax.f32 %v2388_v5, 0.0  ;;  %v2407_v0 = vmax.f32 %v2391_v18, 0.0 }
 0x367   :  { %v2400_v48 = vmax.f32 %v2384_v15, 0.0  ;;  %v2402_v30 = vmax.f32 %v2386_v9, 0.0  ;;  %v2393_v13 = vadd.f32 %v4920_v31, %v2373_v8  ;;  %v2408_v26 = vmax.f32 %v2392_v60, 0.0 }
 0x368   :  { %v2395_v24 = vmax.f32 %v2379_v46, 0.0  ;;  %v2394_v17 = vadd.f32 %v4920_v31, %v2374_v51  ;;  %v3980_v43 = vmov 0.0  }
 0x369   :  { %v2409_v62 = vmax.f32 %v2393_v13, 0.0  ;;  %3916 = vmatprep.subr.mxu0 %v3980_v43 }
 0x36a   :  { %3840 = vmatprep.mubr.msk.f32.mxu1 %vm999_vm1, %v2395_v24  ;;  %3866 = vmatprep.mubr.msk.f32.mxu0 %vm999_vm1, %v2395_v24  ;;  %v2410_v11 = vmax.f32 %v2394_v17, 0.0 }
 0x36b   :  { %3841 = vmatmul.mubr.msk.f32.vlgmr.msra.gmra.mrb[64].mxu1 %vm999_vm1, %v2396_v47  ;;  %3867 = vmatmul.mubr.msk.f32.vlgmr.msra.gmra.mrb[80].mxu0 %vm999_vm1, %v2396_v47 }
 0x36c   :  { %3843 = vmatprep.mubr.msk.f32.mxu1 %vm999_vm1, %v2397_v50  ;;  %3869 = vmatprep.mubr.msk.f32.mxu0 %vm999_vm1, %v2397_v50 }
 0x36d   :  { %3891 = vmatpush3.msra.mxu1 %v4766_v28  ;;  %v2401_v28 = vmax.f32 %v2385_v4, 0.0  ;;  %3917 = vmatpush3.msra.mxu0 %v3102_v2 }
 0x36f   :  { %3844 = vmatmul.mubr.msk.f32.gmra.mrb[66].mxu1 %vm999_vm1, %v2398_v44  ;;  %3870 = vmatmul.mubr.msk.f32.gmra.mrb[82].mxu0 %vm999_vm1, %v2398_v44 }
 0x370   :  { %3846 = vmatprep.mubr.msk.f32.mxu1 %vm999_vm1, %v2399_v58  ;;  %3872 = vmatprep.mubr.msk.f32.mxu0 %vm999_vm1, %v2399_v58 }
 0x373   :  { %3847 = vmatmul.mubr.msk.f32.gmra.mrb[68].mxu1 %vm999_vm1, %v2400_v48  ;;  %3873 = vmatmul.mubr.msk.f32.gmra.mrb[84].mxu0 %vm999_vm1, %v2400_v48 }
 0x374   :  { %3849 = vmatprep.mubr.msk.f32.mxu1 %vm999_vm1, %v2401_v28  ;;  %3875 = vmatprep.mubr.msk.f32.mxu0 %vm999_vm1, %v2401_v28 }
 0x377   :  { %3850 = vmatmul.mubr.msk.f32.gmra.mrb[70].mxu1 %vm999_vm1, %v2402_v30  ;;  %3876 = vmatmul.mubr.msk.f32.gmra.mrb[86].mxu0 %vm999_vm1, %v2402_v30 }
 0x378   :  { %3852 = vmatprep.mubr.msk.f32.mxu1 %vm999_vm1, %v2403_v63  ;;  %3878 = vmatprep.mubr.msk.f32.mxu0 %vm999_vm1, %v2403_v63 }
 0x37b   :  { %3853 = vmatmul.mubr.msk.f32.gmra.mrb[72].mxu1 %vm999_vm1, %v2404_v38  ;;  %3879 = vmatmul.mubr.msk.f32.gmra.mrb[88].mxu0 %vm999_vm1, %v2404_v38 }
 0x37c   :  { %3855 = vmatprep.mubr.msk.f32.mxu1 %vm999_vm1, %v2405_v56  ;;  %3881 = vmatprep.mubr.msk.f32.mxu0 %vm999_vm1, %v2405_v56 }
 0x37f   :  { %3856 = vmatmul.mubr.msk.f32.gmra.mrb[74].mxu1 %vm999_vm1, %v2406_v52  ;;  %3882 = vmatmul.mubr.msk.f32.gmra.mrb[90].mxu0 %vm999_vm1, %v2406_v52 }
 0x380   :  { %3858 = vmatprep.mubr.msk.f32.mxu1 %vm999_vm1, %v2407_v0  ;;  %3884 = vmatprep.mubr.msk.f32.mxu0 %vm999_vm1, %v2407_v0 }
 0x383   :  { %3859 = vmatmul.mubr.msk.f32.gmra.mrb[76].mxu1 %vm999_vm1, %v2408_v26  ;;  %3885 = vmatmul.mubr.msk.f32.gmra.mrb[92].mxu0 %vm999_vm1, %v2408_v26 }
 0x384   :  { %3861 = vmatprep.mubr.msk.f32.mxu1 %vm999_vm1, %v2409_v62  ;;  %3887 = vmatprep.mubr.msk.f32.mxu0 %vm999_vm1, %v2409_v62 }
 0x387   :  { %3862 = vmatmul.mubr.msk.f32.gmra.mrb[78].mxu1 %vm999_vm1, %v2410_v11  ;;  %3888 = vmatmul.mubr.msk.f32.gmra.mrb[94].mxu0 %vm999_vm1, %v2410_v11 }
 0x388   :  { %3892 = vmatprep.mubr.msk.f32.mxu1 %vm999_vm1, %v2395_v24  ;;  %3918 = vmatprep.mubr.msk.f32.mxu0 %vm3981_vm3, %v3980_v43 }
 0x38b   :  { %3893 = vmatmul.mubr.msk.f32.vlgmr.msra.gmra.mrb[80].mxu1 %vm999_vm1, %v2396_v47 }
 0x38c   :  { %3895 = vmatprep.mubr.msk.f32.mxu1 %vm999_vm1, %v2397_v50 }
 0x38f   :  { %3896 = vmatmul.mubr.msk.f32.gmra.mrb[82].mxu1 %vm999_vm1, %v2398_v44 }
 0x390   :  { %3898 = vmatprep.mubr.msk.f32.mxu1 %vm999_vm1, %v2399_v58 }
 0x393   :  { %3899 = vmatmul.mubr.msk.f32.gmra.mrb[84].mxu1 %vm999_vm1, %v2400_v48 }
 0x394   :  { %3901 = vmatprep.mubr.msk.f32.mxu1 %vm999_vm1, %v2401_v28 }
 0x397   :  { %3902 = vmatmul.mubr.msk.f32.gmra.mrb[86].mxu1 %vm999_vm1, %v2402_v30 }
 0x398   :  { %3904 = vmatprep.mubr.msk.f32.mxu1 %vm999_vm1, %v2403_v63 }
 0x39b   :  { %3905 = vmatmul.mubr.msk.f32.gmra.mrb[88].mxu1 %vm999_vm1, %v2404_v38 }
 0x39c   :  { %3907 = vmatprep.mubr.msk.f32.mxu1 %vm999_vm1, %v2405_v56 }
 0x39f   :  { %3908 = vmatmul.mubr.msk.f32.gmra.mrb[90].mxu1 %vm999_vm1, %v2406_v52 }
 0x3a0   :  { %3910 = vmatprep.mubr.msk.f32.mxu1 %vm999_vm1, %v2407_v0 }
 0x3a3   :  { %3911 = vmatmul.mubr.msk.f32.gmra.mrb[92].mxu1 %vm999_vm1, %v2408_v26 }
 0x3a4   :  { %3913 = vmatprep.mubr.msk.f32.mxu1 %vm999_vm1, %v2409_v62 }
 0x3a7   :  { %3914 = vmatmul.mubr.msk.f32.gmra.mrb[94].mxu1 %vm999_vm1, %v2410_v11 }
 0x43e   :  { %v3842_v41 = vpop.f32.mrb[64].mxu1  ;;  %v3868_v20 = vpop.f32.mrb[80].mxu0 }
 0x43f   :  { %v2609_v16 = vrot.slane %v3842_v41, 4  ;;  %v2529_v33 = vpop.f32.mrb[65].mxu1  ;;  %v2722_v3 = vpop.f32.mrb[81].mxu0 }
 0x440   :  { %v2608_v57 = vrot.slane %v2529_v33, 4 }
 0x442   :  { %v2638_v21 = vsel %vm1956_vm11, %v2608_v57, %v2609_v16  ;;  %v3845_v12 = vpop.f32.mrb[66].mxu1  ;;  %v3871_v35 = vpop.f32.mrb[82].mxu0 }
 0x443   :  { %v2728_v25 = vadd.f32 %v3868_v20, %v2638_v21  ;;  %v2611_v7 = vrot.slane %v3845_v12, 4  ;;  %v2539_v61 = vpop.f32.mrb[67].mxu1  ;;  %v2732_v31 = vpop.f32.mrb[83].mxu0 }
 0x444   :  { %v2610_v27 = vrot.slane %v2539_v61, 4 }
 0x446   :  { %v2636_v10 = vsel %vm1956_vm11, %v2610_v27, %v2611_v7  ;;  %v3848_v32 = vpop.f32.mrb[68].mxu1  ;;  %v3874_v6 = vpop.f32.mrb[84].mxu0 }
 0x447   :  { %v2738_v59 = vadd.f32 %v3871_v35, %v2636_v10  ;;  %v2613_v39 = vrot.slane %v3848_v32, 4  ;;  %v2549_v51 = vpop.f32.mrb[69].mxu1  ;;  %v2742_v34 = vpop.f32.mrb[85].mxu0  ;;  %v5036_v10 = vld [vmem:[#allocation3 + $0x78] ss:$0 sm:$0xff] }
 0x448   :  { %v2612_v8 = vrot.slane %v2549_v51, 4 }
 0x44a   :  { %v2634_v46 = vsel %vm1956_vm11, %v2612_v8, %v2613_v39  ;;  %v3851_v14 = vpop.f32.mrb[70].mxu1  ;;  %v3877_v24 = vpop.f32.mrb[86].mxu0 }
 0x44b   :  { %v5014_v47 = vadd.f32 %v3874_v6, %v2634_v46  ;;  %v2615_v54 = vrot.slane %v3851_v14, 4  ;;  %v2559_v50 = vpop.f32.mrb[71].mxu1  ;;  %v2752_v40 = vpop.f32.mrb[87].mxu0 }
 0x44c   :  { %v2614_v44 = vrot.slane %v2559_v50, 4 }
 0x44e   :  { %v2632_v15 = vsel %vm1956_vm11, %v2614_v44, %v2615_v54  ;;  %v3854_v58 = vpop.f32.mrb[72].mxu1  ;;  %v3880_v4 = vpop.f32.mrb[88].mxu0 }
 0x44f   :  { %v5018_v48 = vadd.f32 %v3877_v24, %v2632_v15  ;;  %v2617_v9 = vrot.slane %v3854_v58, 4  ;;  %v2569_v28 = vpop.f32.mrb[73].mxu1  ;;  %v2762_v45 = vpop.f32.mrb[89].mxu0 }
 0x450   :  { %v2616_v30 = vrot.slane %v2569_v28, 4 }
 0x452   :  { %v2630_v5 = vsel %vm1956_vm11, %v2616_v30, %v2617_v9  ;;  %v3857_v63 = vpop.f32.mrb[74].mxu1  ;;  %v3883_v49 = vpop.f32.mrb[90].mxu0 }
 0x453   :  { %v5022_v38 = vadd.f32 %v3880_v4, %v2630_v5  ;;  %v2619_v1 = vrot.slane %v3857_v63, 4  ;;  %v2579_v56 = vpop.f32.mrb[75].mxu1  ;;  %v2772_v18 = vpop.f32.mrb[91].mxu0 }
 0x454   :  { %v2618_v52 = vrot.slane %v2579_v56, 4 }
 0x456   :  { %v2628_v60 = vsel %vm1956_vm11, %v2618_v52, %v2619_v1  ;;  %v3860_v0 = vpop.f32.mrb[76].mxu1  ;;  %v3886_v13 = vpop.f32.mrb[92].mxu0 }
 0x457   :  { %v5026_v26 = vadd.f32 %v3883_v49, %v2628_v60  ;;  %v2621_v17 = vrot.slane %v3860_v0, 4  ;;  %v2589_v62 = vpop.f32.mrb[77].mxu1  ;;  %v2782_v11 = vpop.f32.mrb[93].mxu0 }
 0x458   :  { %v2620_v2 = vrot.slane %v2589_v62, 4 }
 0x45a   :  { %v2626_v43 = vsel %vm1956_vm11, %v2620_v2, %v2621_v17  ;;  %v3863_v41 = vpop.f32.mrb[78].mxu1  ;;  %v3889_v20 = vpop.f32.mrb[94].mxu0 }
 0x45b   :  { %v5030_v16 = vadd.f32 %v3886_v13, %v2626_v43  ;;  %v2623_v33 = vrot.slane %v3863_v41, 4  ;;  %v2599_v3 = vpop.f32.mrb[79].mxu1  ;;  %v2792_v57 = vpop.f32.mrb[95].mxu0 }
 0x45c   :  { %v2622_v21 = vrot.slane %v2599_v3, 4 }
 0x45e   :  { %v2624_v12 = vsel %vm1956_vm11, %v2622_v21, %v2623_v33  ;;  %v3894_v35 = vpop.f32.mrb[80].mxu1 }
 0x45f   :  { %v5034_v7 = vadd.f32 %v3889_v20, %v2624_v12  ;;  %v2947_v61 = vrot.slane %v3894_v35, 6  ;;  %v2867_v31 = vpop.f32.mrb[81].mxu1 }
 0x460   :  { %v2946_v27 = vrot.slane %v2867_v31, 6 }
 0x462   :  { %v2976_v32 = vsel %vm501_vm2, %v2946_v27, %v2947_v61  ;;  %v3897_v6 = vpop.f32.mrb[82].mxu1 }
 0x463   :  { %v2995_v39 = vadd.f32 %v2976_v32, %v2728_v25  ;;  %v2949_v51 = vrot.slane %v3897_v6, 6  ;;  %v2877_v34 = vpop.f32.mrb[83].mxu1 }
 0x464   :  { %v2948_v8 = vrot.slane %v2877_v34, 6 }
 0x465   :  { %v3015_v46 = vadd.f32 %v5036_v10, %v2995_v39 }
 0x466   :  { %v2974_v14 = vsel %vm501_vm2, %v2948_v8, %v2949_v51  ;;  %v3900_v24 = vpop.f32.mrb[84].mxu1 }
 0x467   :  { %v3031_v54 = vmax.f32 %v3015_v46, 0.0  ;;  %v2997_v50 = vadd.f32 %v2974_v14, %v2738_v59  ;;  %v2951_v40 = vrot.slane %v3900_v24, 6  ;;  %v2887_v44 = vpop.f32.mrb[85].mxu1 }
 0x468   :  { %v2950_v15 = vrot.slane %v2887_v44, 6 }
 0x469   :  { %v3047_v58 = vadd.f32 %v3031_v54, %v4647_v22  ;;  %v3017_v4 = vadd.f32 %v5036_v10, %v2997_v50 }
 0x46a   :  { %v2972_v25 = vsel %vm501_vm2, %v2950_v15, %v2951_v40  ;;  %v3903_v9 = vpop.f32.mrb[86].mxu1 }
 0x46b   :  { %v3063_v28 = vmax.f32 %v3047_v58, 0.0  ;;  %v3033_v45 = vmax.f32 %v3017_v4, 0.0  ;;  %v2999_v30 = vadd.f32 %v2972_v25, %v5014_v47  ;;  %v2897_v5 = vpop.f32.mrb[87].mxu1  ;;  %v2953_v63 = vrot.slane %v3903_v9, 6 }
 0x46c   :  { %v2952_v49 = vrot.slane %v2897_v5, 6 }
 0x46d   :  { %3079 = vst.msk [vmem:[#allocation2 + $0x8] sm:$0xff] %vm999_vm1, %v3063_v28  ;;  %v3049_v59 = vadd.f32 %v3033_v45, %v4669_v29  ;;  %v3019_v1 = vadd.f32 %v5036_v10, %v2999_v30 }
 0x46e   :  { %v2970_v22 = vsel %vm501_vm2, %v2952_v49, %v2953_v63  ;;  %v3906_v56 = vpop.f32.mrb[88].mxu1 }
 0x46f   :  { %v3065_v18 = vmax.f32 %v3049_v59, 0.0  ;;  %v3035_v52 = vmax.f32 %v3019_v1, 0.0  ;;  %v3001_v60 = vadd.f32 %v2970_v22, %v5018_v48  ;;  %v2907_v0 = vpop.f32.mrb[89].mxu1  ;;  %v2955_v13 = vrot.slane %v3906_v56, 6 }
 0x470   :  { %v2954_v62 = vrot.slane %v2907_v0, 6 }
 0x471   :  { %3081 = vst.msk [vmem:[#allocation2 + $0x18] sm:$0xff] %vm999_vm1, %v3065_v18  ;;  %v3051_v47 = vadd.f32 %v3035_v52, %v4685_v55  ;;  %v3021_v17 = vadd.f32 %v5036_v10, %v3001_v60 }
 0x472   :  { %v3909_v29 = vpop.f32.mrb[90].mxu1  ;;  %v2968_v43 = vsel %vm501_vm2, %v2954_v62, %v2955_v13 }
 0x473   :  { %v3067_v11 = vmax.f32 %v3051_v47, 0.0  ;;  %v3037_v2 = vmax.f32 %v3021_v17, 0.0  ;;  %v2917_v41 = vpop.f32.mrb[91].mxu1  ;;  %v3003_v20 = vadd.f32 %v2968_v43, %v5022_v38  ;;  %v2957_v33 = vrot.slane %v3909_v29, 6 }
 0x474   :  { %v2956_v3 = vrot.slane %v2917_v41, 6 }
 0x475   :  { %3083 = vst.msk [vmem:[#allocation2 + $0x28] sm:$0xff] %vm999_vm1, %v3067_v11  ;;  %v3053_v48 = vadd.f32 %v3037_v2, %v4697_v37  ;;  %v3023_v55 = vadd.f32 %v5036_v10, %v3003_v20 }
 0x476   :  { %v3912_v57 = vpop.f32.mrb[92].mxu1  ;;  %v2966_v12 = vsel %vm501_vm2, %v2956_v3, %v2957_v33 }
 0x477   :  { %v3069_v21 = vmax.f32 %v3053_v48, 0.0  ;;  %v2927_v35 = vpop.f32.mrb[93].mxu1  ;;  %v3039_v61 = vmax.f32 %v3023_v55, 0.0  ;;  %v3005_v31 = vadd.f32 %v2966_v12, %v5026_v26  ;;  %v2959_v38 = vrot.slane %v3912_v57, 6 }
 0x478   :  { %v2958_v27 = vrot.slane %v2927_v35, 6  ;;  %v3095_v23 = vld [vmem:[#allocation2 + $0xf] ss:$16 sm:$0x3] }
 0x479   :  { %3085 = vst.msk [vmem:[#allocation2 + $0x38] sm:$0xff] %vm999_vm1, %v3069_v21  ;;  %v3055_v32 = vadd.f32 %v3039_v61, %v4709_v53  ;;  %v3025_v37 = vadd.f32 %v5036_v10, %v3005_v31 }
 0x47a   :  { %v3915_v6 = vpop.f32.mrb[94].mxu1  ;;  %v2964_v39 = vsel %vm501_vm2, %v2958_v27, %v2959_v38 }
 0x47b   :  { %v2937_v51 = vpop.f32.mrb[95].mxu1  ;;  %v3071_v34 = vmax.f32 %v3055_v32, 0.0  ;;  %v3041_v8 = vmax.f32 %v3025_v37, 0.0  ;;  %v3007_v46 = vadd.f32 %v2964_v39, %v5030_v16  ;;  %v2961_v14 = vrot.slane %v3915_v6, 6 }
 0x47c   :  { %v2960_v54 = vrot.slane %v2937_v51, 6 }
 0x47d   :  { %3087 = vst.msk [vmem:[#allocation2 + $0x48] sm:$0xff] %vm999_vm1, %v3071_v34  ;;  %v3057_v26 = vadd.f32 %v3041_v8, %v4717_v36  ;;  %v3027_v24 = vadd.f32 %v5036_v10, %v3007_v46 }
 0x47e   :  { %v2962_v40 = vsel %vm501_vm2, %v2960_v54, %v2961_v14 }
 0x47f   :  { %v3073_v53 = vmax.f32 %v3057_v26, 0.0  ;;  %v3043_v50 = vmax.f32 %v3027_v24, 0.0  ;;  %v3009_v15 = vadd.f32 %v2962_v40, %v5034_v7  ;;  %v3396_v7 = vld [vmem:[#allocation3 + $0x88] ss:$0 sm:$0xff] }
 0x480   :  { %v3096_v9 = vld [vmem:[#allocation2 + $0xf] ss:$16 sm:$0xc] }
 0x481   :  { %3089 = vst.msk [vmem:[#allocation2 + $0x58] sm:$0xff] %vm999_vm1, %v3073_v53  ;;  %v3059_v44 = vadd.f32 %v3043_v50, %v4725_v19  ;;  %v3029_v58 = vadd.f32 %v5036_v10, %v3009_v15  ;;  %v3097_v45 = vor.u32 %v3096_v9, %v3095_v23 }
 0x483   :  { %v3075_v16 = vmax.f32 %v3059_v44, 0.0  ;;  %v3045_v36 = vmax.f32 %v3029_v58, 0.0 }
 0x485   :  { %3091 = vst.msk [vmem:[#allocation2 + $0x68] sm:$0xff] %vm999_vm1, %v3075_v16  ;;  %v3061_v4 = vadd.f32 %v3045_v36, %v4733_v42 }
 0x487   :  { %v3077_v25 = vmax.f32 %v3061_v4, 0.0 }
 0x488   :  { %v3098_v28 = vld [vmem:[#allocation2 + $0xf] ss:$16 sm:$0x30] }
 0x489   :  { %3093 = vst.msk [vmem:[#allocation2 + $0x78] sm:$0xff] %vm999_vm1, %v3077_v25  ;;  %v3099_v30 = vor.u32 %v3098_v28, %v3097_v45 }
 0x490   :  { %v3100_v5 = vld [vmem:[#allocation2 + $0xf] ss:$16 sm:$0xc0] }
 0x491   :  { %v3101_v19 = vor.u32 %v3100_v5, %v3099_v30 }
 0x493   :  { %3919 = vmatmul.mubr.msk.f32.vlgmr.msra.gmra.mrb[96].mxu0 %vm999_vm1, %v3101_v19 }
 0x566   :  { %v3177_v10 = vpop.f32.mrb[96].mxu0 }
 0x567   :  { %v3178_v63 = vadd.f32 %v3396_v7, %v3177_v10  ;;  %v3920_v49 = vpop.f32.mrb[97].mxu0 }
 0x569   :  { %3181 = vst [vmem:[#allocation6] sm:$0xff] %v3178_v63 }
 0x56a   :  { %3961 = shalt.err (!%p3958_p12)
}
 0x56b   :  { %s3962_s30 = scalar_lea.hbm %s5099_s2, 128 }
 0x56c   :  { %p3963_p13 = scmp.ne.s32.totalorder %s5099_s2, %s3962_s30  ;;  %p3966_p0 = scmp.lt.u32.totalorder %s3962_s30, %s5099_s2 }
 0x56e   :  { %p3968_p1 = pnand %p3966_p0, %p3963_p13 }
 0x570   :  { %3971 = shalt.err (!%p3968_p1)
}
 0x571   :  { %3191 = dma.vmem_to_hbm [thread:$0]  %s3189_s1, 128, %s5099_s2, [#allocation5]  }
 0x572   :  { %3974 = dma.done.wait [#allocation5], 128  }
 0x573   :  { %3975 = vsyncadd [#allocation5], 4294967168 }
 0x574   :  { %3195 = vsyncpa [#allocation4], 1 }
 0x575   :  { %3196 = vsyncpa [#allocation5], 1 }

</bundles_post_ra>
